<compile_context>
chip_gen: v6e
topology: v6e:2x2x1
jax: 0.10.0
libtpu: 0.0.40
codegen_flags: <defaults>
</compile_context>

<pallas_src>
import math

import jax
import jax.numpy as jnp
import numpy as np
from jax.experimental import pallas as pl
from jax.experimental.pallas import tpu as pltpu

# ----------------------------- configuration --------------------------------
N_CHANNELS = 32
HEADS = 1                     # default in the module signature
D = N_CHANNELS * HEADS
POS_DIM = 2
N_LAYERS = 2
N_NODES = 32

BN_EPS = 1e-5
LEAKY_SLOPE = 0.01            # nn.LeakyReLU default
MASK_NEG = -1e30


# ------------------------------ Pallas kernel -------------------------------
def encoder_kernel(x_ref, pos_ref, bias_ref, w_ref, wp_ref, vec_ref, out_ref):
    """Both encoder layers fused: (SpatialAttention -> Add&Norm -> MLP ->
    Add&Norm) x N_LAYERS, x resident in VMEM throughout."""
    x = x_ref[...]            # (N, D)   f32
    pos = pos_ref[...]        # (N, P)   f32
    att_bias = bias_ref[...]  # (N, N)   f32 additive mask (0 / -1e30)

    def mxu(a_f32, w_bf16):
        # bf16 MXU operands, f32 accumulation.
        return jnp.dot(a_f32.astype(jnp.bfloat16), w_bf16,
                       preferred_element_type=jnp.float32)

    def batchnorm(z, gamma, beta):
        mu = jnp.mean(z, axis=0, keepdims=True)
        zc = z - mu                                   # centered once, reused
        var = jnp.mean(zc * zc, axis=0, keepdims=True)
        return gamma * (zc * jax.lax.rsqrt(var + BN_EPS)) + beta

    ch = D // HEADS
    for l in range(N_LAYERS):                         # static unroll
        wq, wk, wv, w1, w2 = (w_ref[l, i] for i in range(5))   # (D, D) bf16
        wp = wp_ref[l]                                         # (P, D) f32

        def vec(i, _l=l):
            return vec_ref[_l, i:i + 1, :]                     # (1, D) f32

        bq, bk, bv, bp, b1, b2 = (vec(i) for i in range(6))
        ga, ba, gbn, bbn, gm, bm = (vec(i) for i in range(6, 12))

        # -------- SpatialAttention (1/sqrt(ch) pre-folded into wq/bq) --------
        pe = jnp.dot(pos, wp, preferred_element_type=jnp.float32) + bp
        xq = x + pe
        q = mxu(xq, wq) + bq
        k = mxu(xq, wk) + bk
        v = mxu(x, wv) + bv

        head_outs = []
        for h in range(HEADS):                        # static, small
            sl = slice(h * ch, (h + 1) * ch)
            qh = q[:, sl].astype(jnp.bfloat16)
            kh = k[:, sl].astype(jnp.bfloat16)
            s = jax.lax.dot_general(qh, kh, (((1,), (1,)), ((), ())),
                                    preferred_element_type=jnp.float32)
            s = s + att_bias                          # edge masking: one add
            s = s - jnp.max(s, axis=-1, keepdims=True)
            p = jnp.exp(s)
            denom = jnp.sum(p, axis=-1, keepdims=True)
            p = p * pl.reciprocal(denom, approx=True)
            head_outs.append(
                jnp.dot(p.astype(jnp.bfloat16), v[:, sl].astype(jnp.bfloat16),
                        preferred_element_type=jnp.float32))
        y = head_outs[0] if HEADS == 1 else jnp.concatenate(head_outs, axis=-1)

        # -------- Add & Norm (norm_att) --------
        x1 = batchnorm(x + y, ga, ba)

        # -------- MLP: Linear -> BatchNorm -> LeakyReLU -> Linear --------
        h1 = mxu(x1, w1) + b1
        h1 = batchnorm(h1, gbn, bbn)
        h1 = jnp.where(h1 >= 0.0, h1, LEAKY_SLOPE * h1)
        h2 = mxu(h1, w2) + b2

        # -------- Add & Norm (norm_mlp) --------
        x = batchnorm(x1 + h2, gm, bm)

    # TODO(synk): at N=32 the (N, 32) output lowers to masked stores; lane-dense
    #             repacking only pays off once graphs are batched.
    out_ref[...] = x


@jax.jit
def spatial_transformer_encoder(x, pos, att_bias, w_slab, wp_slab, vec_slab):
    """Single fused pallas_call for all layers (everything resident in VMEM)."""
    n = x.shape[0]
    vmem = pl.BlockSpec(memory_space=pltpu.MemorySpace.VMEM)
    return pl.pallas_call(
        encoder_kernel,
        out_shape=jax.ShapeDtypeStruct((n, D), jnp.float32),
        in_specs=[vmem] * 6,
        out_specs=vmem,
    )(x, pos, att_bias, w_slab, wp_slab, vec_slab)


# --------------------------- parameter packing -------------------------------
def pack_params(layer_params):
    """Pack 18 per-layer tensors into 3 slabs; fold the attention scale into
    Wq / bq; cast MXU weights to bf16 (wrapper-side parameter prep)."""
    scale = 1.0 / math.sqrt(D // HEADS)
    w_rows, wp_rows, vec_rows = [], [], []
    for (wq, bq, wk, bk, wv, bv, wp, bp, ga, ba,
         w1, b1, gbn, bbn, w2, b2, gm, bm) in layer_params:
        w_rows.append(jnp.stack([wq * scale, wk, wv, w1, w2]))
        wp_rows.append(wp)
        vec_rows.append(jnp.concatenate(
            [bq * scale, bk, bv, bp, b1, b2, ga, ba, gbn, bbn, gm, bm], axis=0))
    w_slab = jnp.stack(w_rows).astype(jnp.bfloat16)   # (L, 5, D, D)  bf16
    wp_slab = jnp.stack(wp_rows)                      # (L, P, D)     f32
    vec_slab = jnp.stack(vec_rows)                    # (L, 12, D)    f32
    return w_slab, wp_slab, vec_slab


# --------------------------- pure-JAX reference -----------------------------
def reference_forward(x, pos, adj, layer_params):
    """Reference with the same (reviewer-approved) mixed precision as the
    kernel: bf16 MXU operands, f32 accumulation / softmax / batchnorm."""
    def bmm(a, b):
        return jnp.dot(a.astype(jnp.bfloat16), b.astype(jnp.bfloat16),
                       preferred_element_type=jnp.float32)

    def batchnorm(z, gamma, beta):
        mu = jnp.mean(z, axis=0, keepdims=True)
        zc = z - mu
        var = jnp.mean(zc * zc, axis=0, keepdims=True)
        return gamma * (zc * jax.lax.rsqrt(var + BN_EPS)) + beta

    ch = D // HEADS
    scale = 1.0 / math.sqrt(ch)
    for (wq, bq, wk, bk, wv, bv, wp, bp, ga, ba,
         w1, b1, gbn, bbn, w2, b2, gm, bm) in layer_params:
        pe = jnp.dot(pos, wp, preferred_element_type=jnp.float32) + bp
        xq = x + pe
        q = bmm(xq, wq * scale) + bq * scale          # same fold as kernel
        k = bmm(xq, wk) + bk
        v = bmm(x, wv) + bv
        heads = []
        for h in range(HEADS):
            sl = slice(h * ch, (h + 1) * ch)
            s = bmm(q[:, sl], k[:, sl].T)
            s = jnp.where(adj > 0.5, s, jnp.float32(MASK_NEG))
            s = s - jnp.max(s, axis=-1, keepdims=True)
            p = jnp.exp(s)
            p = p / jnp.sum(p, axis=-1, keepdims=True)
            heads.append(bmm(p, v[:, sl]))
        y = heads[0] if HEADS == 1 else jnp.concatenate(heads, axis=-1)
        x1 = batchnorm(x + y, ga, ba)
        h1 = bmm(x1, w1) + b1
        h1 = batchnorm(h1, gbn, bbn)
        h1 = jnp.where(h1 >= 0.0, h1, LEAKY_SLOPE * h1)
        h2 = bmm(h1, w2) + b2
        x = batchnorm(x1 + h2, gm, bm)
    return x


# ------------------------------ parameter init ------------------------------
def init_params(key):
    layers = []
    for _ in range(N_LAYERS):
        key, *ks = jax.random.split(key, 13)

        def w(k, din, dout):
            return jax.random.normal(k, (din, dout), jnp.float32) / np.sqrt(din)

        def b(k, dout):
            return 0.1 * jax.random.normal(k, (1, dout), jnp.float32)

        ones = jnp.ones((1, D), jnp.float32)
        zeros = jnp.zeros((1, D), jnp.float32)
        params = (
            w(ks[0], D, D), b(ks[1], D),            # Wq, bq
            w(ks[2], D, D), b(ks[3], D),            # Wk, bk
            w(ks[4], D, D), b(ks[5], D),            # Wv, bv
            w(ks[6], POS_DIM, D), b(ks[7], D),      # Wp, bp (positional emb)
            ones, zeros,                            # norm_att  gamma/beta
            w(ks[8], D, D), b(ks[9], D),            # MLP lin1
            ones, zeros,                            # MLP batch_norm gamma/beta
            w(ks[10], D, D), b(ks[11], D),          # MLP lin2 (plain_last)
            ones, zeros,                            # norm_mlp  gamma/beta
        )
        layers.append(params)
    return tuple(layers)


# ----------------------------------- main ------------------------------------
if __name__ == "__main__":
    key = jax.random.PRNGKey(0)
    kx, kp, kparams = jax.random.split(key, 3)

    N = N_NODES
    x = jax.random.normal(kx, (N, D), jnp.float32)          # (N, n_channels*heads)
    pos = jax.random.normal(kp, (N, POS_DIM), jnp.float32)  # (N, pos_dim)

    # Deterministic graph: each node connected to neighbors with |i-j| <= 2
    # (includes self-loops).  edge_index follows PyG convention (src, dst).
    src, dst = [], []
    for i in range(N):
        for j in range(N):
            if abs(i - j) <= 2:
                src.append(j)
                dst.append(i)
    edge_index = jnp.asarray([src, dst], dtype=jnp.int32)   # (2, E)

    # Glue: sparse edge_index -> dense (N_dst, N_src) adjacency and additive
    # attention bias (0 where dst attends to src, -1e30 elsewhere).
    adj = jnp.zeros((N, N), jnp.float32).at[edge_index[1], edge_index[0]].set(1.0)
    att_bias = jnp.where(adj > 0.5, 0.0, MASK_NEG).astype(jnp.float32)

    layer_params = init_params(kparams)
    w_slab, wp_slab, vec_slab = pack_params(layer_params)

    out = spatial_transformer_encoder(x, pos, att_bias, w_slab, wp_slab, vec_slab)
    out = jax.block_until_ready(out)

    assert out.shape == (N, D) and out.dtype == jnp.float32
    ref = reference_forward(x, pos, adj, layer_params)
    np.testing.assert_allclose(np.asarray(out), np.asarray(ref),
                               rtol=2e-2, atol=2e-2)
    print("KERNEL_OK")
</pallas_src>

<mosaic_0001>
module attributes {stable_mosaic.version = 11 : i64} {
  func.func @encoder_kernel(%arg0: memref<32x32xf32, #tpu.memory_space<vmem>>, %arg1: memref<32x2xf32, #tpu.memory_space<vmem>>, %arg2: memref<32x32xf32, #tpu.memory_space<vmem>>, %arg3: memref<2x5x32x32xbf16, #tpu.memory_space<vmem>>, %arg4: memref<2x2x32xf32, #tpu.memory_space<vmem>>, %arg5: memref<2x12x32xf32, #tpu.memory_space<vmem>>, %arg6: memref<32x32xf32, #tpu.memory_space<vmem>>) attributes {dimension_semantics = [], scalar_prefetch = 0 : i64, scratch_operands = 0 : i64, tpu.core_type = #tpu.core_type<tc>} {
    %c0 = arith.constant 0 : index
    %c0_0 = arith.constant 0 : index
    %0 = vector.load %arg0[%c0, %c0_0] : memref<32x32xf32, #tpu.memory_space<vmem>>, vector<32x32xf32>
    %c0_1 = arith.constant 0 : index
    %c0_2 = arith.constant 0 : index
    %1 = vector.load %arg1[%c0_1, %c0_2] : memref<32x2xf32, #tpu.memory_space<vmem>>, vector<32x2xf32>
    %c0_3 = arith.constant 0 : index
    %c0_4 = arith.constant 0 : index
    %2 = vector.load %arg2[%c0_3, %c0_4] : memref<32x32xf32, #tpu.memory_space<vmem>>, vector<32x32xf32>
    %c0_5 = arith.constant 0 : index
    %c0_6 = arith.constant 0 : index
    %c0_7 = arith.constant 0 : index
    %c0_8 = arith.constant 0 : index
    %3 = vector.load %arg3[%c0_5, %c0_6, %c0_7, %c0_8] : memref<2x5x32x32xbf16, #tpu.memory_space<vmem>>, vector<1x1x32x32xbf16>
    %4 = vector.shape_cast %3 : vector<1x1x32x32xbf16> to vector<32x32xbf16>
    %c0_9 = arith.constant 0 : index
    %c1 = arith.constant 1 : index
    %c0_10 = arith.constant 0 : index
    %c0_11 = arith.constant 0 : index
    %5 = vector.load %arg3[%c0_9, %c1, %c0_10, %c0_11] : memref<2x5x32x32xbf16, #tpu.memory_space<vmem>>, vector<1x1x32x32xbf16>
    %6 = vector.shape_cast %5 : vector<1x1x32x32xbf16> to vector<32x32xbf16>
    %c0_12 = arith.constant 0 : index
    %c2 = arith.constant 2 : index
    %c0_13 = arith.constant 0 : index
    %c0_14 = arith.constant 0 : index
    %7 = vector.load %arg3[%c0_12, %c2, %c0_13, %c0_14] : memref<2x5x32x32xbf16, #tpu.memory_space<vmem>>, vector<1x1x32x32xbf16>
    %8 = vector.shape_cast %7 : vector<1x1x32x32xbf16> to vector<32x32xbf16>
    %c0_15 = arith.constant 0 : index
    %c3 = arith.constant 3 : index
    %c0_16 = arith.constant 0 : index
    %c0_17 = arith.constant 0 : index
    %9 = vector.load %arg3[%c0_15, %c3, %c0_16, %c0_17] : memref<2x5x32x32xbf16, #tpu.memory_space<vmem>>, vector<1x1x32x32xbf16>
    %10 = vector.shape_cast %9 : vector<1x1x32x32xbf16> to vector<32x32xbf16>
    %c0_18 = arith.constant 0 : index
    %c4 = arith.constant 4 : index
    %c0_19 = arith.constant 0 : index
    %c0_20 = arith.constant 0 : index
    %11 = vector.load %arg3[%c0_18, %c4, %c0_19, %c0_20] : memref<2x5x32x32xbf16, #tpu.memory_space<vmem>>, vector<1x1x32x32xbf16>
    %12 = vector.shape_cast %11 : vector<1x1x32x32xbf16> to vector<32x32xbf16>
    %c0_21 = arith.constant 0 : index
    %c0_22 = arith.constant 0 : index
    %c0_23 = arith.constant 0 : index
    %13 = vector.load %arg4[%c0_21, %c0_22, %c0_23] : memref<2x2x32xf32, #tpu.memory_space<vmem>>, vector<1x2x32xf32>
    %14 = vector.shape_cast %13 : vector<1x2x32xf32> to vector<2x32xf32>
    %c0_24 = arith.constant 0 : index
    %c0_25 = arith.constant 0 : index
    %c0_26 = arith.constant 0 : index
    %15 = vector.load %arg5[%c0_24, %c0_25, %c0_26] : memref<2x12x32xf32, #tpu.memory_space<vmem>>, vector<1x1x32xf32>
    %16 = vector.shape_cast %15 : vector<1x1x32xf32> to vector<1x32xf32>
    %c0_27 = arith.constant 0 : index
    %c1_28 = arith.constant 1 : index
    %c0_29 = arith.constant 0 : index
    %17 = vector.load %arg5[%c0_27, %c1_28, %c0_29] : memref<2x12x32xf32, #tpu.memory_space<vmem>>, vector<1x1x32xf32>
    %18 = vector.shape_cast %17 : vector<1x1x32xf32> to vector<1x32xf32>
    %c0_30 = arith.constant 0 : index
    %c2_31 = arith.constant 2 : index
    %c0_32 = arith.constant 0 : index
    %19 = vector.load %arg5[%c0_30, %c2_31, %c0_32] : memref<2x12x32xf32, #tpu.memory_space<vmem>>, vector<1x1x32xf32>
    %20 = vector.shape_cast %19 : vector<1x1x32xf32> to vector<1x32xf32>
    %c0_33 = arith.constant 0 : index
    %c3_34 = arith.constant 3 : index
    %c0_35 = arith.constant 0 : index
    %21 = vector.load %arg5[%c0_33, %c3_34, %c0_35] : memref<2x12x32xf32, #tpu.memory_space<vmem>>, vector<1x1x32xf32>
    %22 = vector.shape_cast %21 : vector<1x1x32xf32> to vector<1x32xf32>
    %c0_36 = arith.constant 0 : index
    %c4_37 = arith.constant 4 : index
    %c0_38 = arith.constant 0 : index
    %23 = vector.load %arg5[%c0_36, %c4_37, %c0_38] : memref<2x12x32xf32, #tpu.memory_space<vmem>>, vector<1x1x32xf32>
    %24 = vector.shape_cast %23 : vector<1x1x32xf32> to vector<1x32xf32>
    %c0_39 = arith.constant 0 : index
    %c5 = arith.constant 5 : index
    %c0_40 = arith.constant 0 : index
    %25 = vector.load %arg5[%c0_39, %c5, %c0_40] : memref<2x12x32xf32, #tpu.memory_space<vmem>>, vector<1x1x32xf32>
    %26 = vector.shape_cast %25 : vector<1x1x32xf32> to vector<1x32xf32>
    %c0_41 = arith.constant 0 : index
    %c6 = arith.constant 6 : index
    %c0_42 = arith.constant 0 : index
    %27 = vector.load %arg5[%c0_41, %c6, %c0_42] : memref<2x12x32xf32, #tpu.memory_space<vmem>>, vector<1x1x32xf32>
    %28 = vector.shape_cast %27 : vector<1x1x32xf32> to vector<1x32xf32>
    %c0_43 = arith.constant 0 : index
    %c7 = arith.constant 7 : index
    %c0_44 = arith.constant 0 : index
    %29 = vector.load %arg5[%c0_43, %c7, %c0_44] : memref<2x12x32xf32, #tpu.memory_space<vmem>>, vector<1x1x32xf32>
    %30 = vector.shape_cast %29 : vector<1x1x32xf32> to vector<1x32xf32>
    %c0_45 = arith.constant 0 : index
    %c8 = arith.constant 8 : index
    %c0_46 = arith.constant 0 : index
    %31 = vector.load %arg5[%c0_45, %c8, %c0_46] : memref<2x12x32xf32, #tpu.memory_space<vmem>>, vector<1x1x32xf32>
    %32 = vector.shape_cast %31 : vector<1x1x32xf32> to vector<1x32xf32>
    %c0_47 = arith.constant 0 : index
    %c9 = arith.constant 9 : index
    %c0_48 = arith.constant 0 : index
    %33 = vector.load %arg5[%c0_47, %c9, %c0_48] : memref<2x12x32xf32, #tpu.memory_space<vmem>>, vector<1x1x32xf32>
    %34 = vector.shape_cast %33 : vector<1x1x32xf32> to vector<1x32xf32>
    %c0_49 = arith.constant 0 : index
    %c10 = arith.constant 10 : index
    %c0_50 = arith.constant 0 : index
    %35 = vector.load %arg5[%c0_49, %c10, %c0_50] : memref<2x12x32xf32, #tpu.memory_space<vmem>>, vector<1x1x32xf32>
    %36 = vector.shape_cast %35 : vector<1x1x32xf32> to vector<1x32xf32>
    %c0_51 = arith.constant 0 : index
    %c11 = arith.constant 11 : index
    %c0_52 = arith.constant 0 : index
    %37 = vector.load %arg5[%c0_51, %c11, %c0_52] : memref<2x12x32xf32, #tpu.memory_space<vmem>>, vector<1x1x32xf32>
    %38 = vector.shape_cast %37 : vector<1x1x32xf32> to vector<1x32xf32>
    %cst = arith.constant dense<0.000000e+00> : vector<32x32xf32>
    %39 = tpu.matmul %1, %14, %cst {dimension_numbers = #tpu.dot_dimension_numbers<[1], [0], [0], [1], [0, 0, 1, 1], [], []>} : vector<32x2xf32>, vector<2x32xf32>, vector<32x32xf32> -> vector<32x32xf32>
    %40 = vector.broadcast %22 : vector<1x32xf32> to vector<32x32xf32>
    %41 = arith.addf %39, %40 : vector<32x32xf32>
    %42 = arith.addf %0, %41 : vector<32x32xf32>
    %43 = arith.truncf %42 : vector<32x32xf32> to vector<32x32xbf16>
    %cst_53 = arith.constant dense<0.000000e+00> : vector<32x32xf32>
    %44 = tpu.matmul %43, %4, %cst_53 {dimension_numbers = #tpu.dot_dimension_numbers<[1], [0], [0], [1], [0, 0, 1, 1], [], []>} : vector<32x32xbf16>, vector<32x32xbf16>, vector<32x32xf32> -> vector<32x32xf32>
    %45 = vector.broadcast %16 : vector<1x32xf32> to vector<32x32xf32>
    %46 = arith.addf %44, %45 : vector<32x32xf32>
    %47 = arith.truncf %42 : vector<32x32xf32> to vector<32x32xbf16>
    %cst_54 = arith.constant dense<0.000000e+00> : vector<32x32xf32>
    %48 = tpu.matmul %47, %6, %cst_54 {dimension_numbers = #tpu.dot_dimension_numbers<[1], [0], [0], [1], [0, 0, 1, 1], [], []>} : vector<32x32xbf16>, vector<32x32xbf16>, vector<32x32xf32> -> vector<32x32xf32>
    %49 = vector.broadcast %18 : vector<1x32xf32> to vector<32x32xf32>
    %50 = arith.addf %48, %49 : vector<32x32xf32>
    %51 = arith.truncf %0 : vector<32x32xf32> to vector<32x32xbf16>
    %cst_55 = arith.constant dense<0.000000e+00> : vector<32x32xf32>
    %52 = tpu.matmul %51, %8, %cst_55 {dimension_numbers = #tpu.dot_dimension_numbers<[1], [0], [0], [1], [0, 0, 1, 1], [], []>} : vector<32x32xbf16>, vector<32x32xbf16>, vector<32x32xf32> -> vector<32x32xf32>
    %53 = vector.broadcast %20 : vector<1x32xf32> to vector<32x32xf32>
    %54 = arith.addf %52, %53 : vector<32x32xf32>
    %55 = arith.truncf %46 : vector<32x32xf32> to vector<32x32xbf16>
    %56 = arith.truncf %50 : vector<32x32xf32> to vector<32x32xbf16>
    %cst_56 = arith.constant dense<0.000000e+00> : vector<32x32xf32>
    %57 = tpu.matmul %55, %56, %cst_56 {dimension_numbers = #tpu.dot_dimension_numbers<[1], [1], [0], [0], [0, 0, 1, 0], [], []>} : vector<32x32xbf16>, vector<32x32xbf16>, vector<32x32xf32> -> vector<32x32xf32>
    %58 = arith.addf %57, %2 : vector<32x32xf32>
    %cst_57 = arith.constant dense<0xFF800000> : vector<32xf32>
    %59 = vector.multi_reduction <maximumf>, %58, %cst_57 [1] : vector<32x32xf32> to vector<32xf32>
    %60 = vector.shape_cast %59 : vector<32xf32> to vector<32x1xf32>
    %61 = vector.broadcast %60 : vector<32x1xf32> to vector<32x32xf32>
    %62 = arith.subf %58, %61 : vector<32x32xf32>
    %63 = math.exp %62 : vector<32x32xf32>
    %cst_58 = arith.constant dense<0.000000e+00> : vector<32xf32>
    %64 = vector.multi_reduction <add>, %63, %cst_58 [1] : vector<32x32xf32> to vector<32xf32>
    %65 = vector.shape_cast %64 : vector<32xf32> to vector<32x1xf32>
    %66 = tpu.reciprocal %65 {approx = true} : vector<32x1xf32> -> vector<32x1xf32>
    %67 = vector.broadcast %66 : vector<32x1xf32> to vector<32x32xf32>
    %68 = arith.mulf %63, %67 : vector<32x32xf32>
    %69 = arith.truncf %68 : vector<32x32xf32> to vector<32x32xbf16>
    %70 = arith.truncf %54 : vector<32x32xf32> to vector<32x32xbf16>
    %cst_59 = arith.constant dense<0.000000e+00> : vector<32x32xf32>
    %71 = tpu.matmul %69, %70, %cst_59 {dimension_numbers = #tpu.dot_dimension_numbers<[1], [0], [0], [1], [0, 0, 1, 1], [], []>} : vector<32x32xbf16>, vector<32x32xbf16>, vector<32x32xf32> -> vector<32x32xf32>
    %72 = arith.addf %0, %71 : vector<32x32xf32>
    %cst_60 = arith.constant dense<0.000000e+00> : vector<32xf32>
    %73 = vector.multi_reduction <add>, %72, %cst_60 [0] : vector<32x32xf32> to vector<32xf32>
    %74 = vector.shape_cast %73 : vector<32xf32> to vector<1x32xf32>
    %cst_61 = arith.constant 3.200000e+01 : f32
    %75 = vector.broadcast %cst_61 : f32 to vector<1x32xf32>
    %76 = arith.divf %74, %75 : vector<1x32xf32>
    %77 = vector.broadcast %76 : vector<1x32xf32> to vector<32x32xf32>
    %78 = arith.subf %72, %77 : vector<32x32xf32>
    %79 = arith.mulf %78, %78 : vector<32x32xf32>
    %cst_62 = arith.constant dense<0.000000e+00> : vector<32xf32>
    %80 = vector.multi_reduction <add>, %79, %cst_62 [0] : vector<32x32xf32> to vector<32xf32>
    %81 = vector.shape_cast %80 : vector<32xf32> to vector<1x32xf32>
    %cst_63 = arith.constant 3.200000e+01 : f32
    %82 = vector.broadcast %cst_63 : f32 to vector<1x32xf32>
    %83 = arith.divf %81, %82 : vector<1x32xf32>
    %cst_64 = arith.constant 9.99999974E-6 : f32
    %84 = vector.broadcast %cst_64 : f32 to vector<1x32xf32>
    %85 = arith.addf %83, %84 : vector<1x32xf32>
    %86 = math.rsqrt %85 : vector<1x32xf32>
    %87 = vector.broadcast %86 : vector<1x32xf32> to vector<32x32xf32>
    %88 = arith.mulf %78, %87 : vector<32x32xf32>
    %89 = vector.broadcast %28 : vector<1x32xf32> to vector<32x32xf32>
    %90 = arith.mulf %89, %88 : vector<32x32xf32>
    %91 = vector.broadcast %30 : vector<1x32xf32> to vector<32x32xf32>
    %92 = arith.addf %90, %91 : vector<32x32xf32>
    %93 = arith.truncf %92 : vector<32x32xf32> to vector<32x32xbf16>
    %cst_65 = arith.constant dense<0.000000e+00> : vector<32x32xf32>
    %94 = tpu.matmul %93, %10, %cst_65 {dimension_numbers = #tpu.dot_dimension_numbers<[1], [0], [0], [1], [0, 0, 1, 1], [], []>} : vector<32x32xbf16>, vector<32x32xbf16>, vector<32x32xf32> -> vector<32x32xf32>
    %95 = vector.broadcast %24 : vector<1x32xf32> to vector<32x32xf32>
    %96 = arith.addf %94, %95 : vector<32x32xf32>
    %cst_66 = arith.constant dense<0.000000e+00> : vector<32xf32>
    %97 = vector.multi_reduction <add>, %96, %cst_66 [0] : vector<32x32xf32> to vector<32xf32>
    %98 = vector.shape_cast %97 : vector<32xf32> to vector<1x32xf32>
    %cst_67 = arith.constant 3.200000e+01 : f32
    %99 = vector.broadcast %cst_67 : f32 to vector<1x32xf32>
    %100 = arith.divf %98, %99 : vector<1x32xf32>
    %101 = vector.broadcast %100 : vector<1x32xf32> to vector<32x32xf32>
    %102 = arith.subf %96, %101 : vector<32x32xf32>
    %103 = arith.mulf %102, %102 : vector<32x32xf32>
    %cst_68 = arith.constant dense<0.000000e+00> : vector<32xf32>
    %104 = vector.multi_reduction <add>, %103, %cst_68 [0] : vector<32x32xf32> to vector<32xf32>
    %105 = vector.shape_cast %104 : vector<32xf32> to vector<1x32xf32>
    %cst_69 = arith.constant 3.200000e+01 : f32
    %106 = vector.broadcast %cst_69 : f32 to vector<1x32xf32>
    %107 = arith.divf %105, %106 : vector<1x32xf32>
    %cst_70 = arith.constant 9.99999974E-6 : f32
    %108 = vector.broadcast %cst_70 : f32 to vector<1x32xf32>
    %109 = arith.addf %107, %108 : vector<1x32xf32>
    %110 = math.rsqrt %109 : vector<1x32xf32>
    %111 = vector.broadcast %110 : vector<1x32xf32> to vector<32x32xf32>
    %112 = arith.mulf %102, %111 : vector<32x32xf32>
    %113 = vector.broadcast %32 : vector<1x32xf32> to vector<32x32xf32>
    %114 = arith.mulf %113, %112 : vector<32x32xf32>
    %115 = vector.broadcast %34 : vector<1x32xf32> to vector<32x32xf32>
    %116 = arith.addf %114, %115 : vector<32x32xf32>
    %cst_71 = arith.constant 0.000000e+00 : f32
    %117 = vector.broadcast %cst_71 : f32 to vector<32x32xf32>
    %118 = arith.cmpf oge, %116, %117 : vector<32x32xf32>
    %cst_72 = arith.constant 0.00999999977 : f32
    %119 = vector.broadcast %cst_72 : f32 to vector<32x32xf32>
    %120 = arith.mulf %119, %116 : vector<32x32xf32>
    %121 = arith.select %118, %116, %120 : vector<32x32xi1>, vector<32x32xf32>
    %122 = arith.truncf %121 : vector<32x32xf32> to vector<32x32xbf16>
    %cst_73 = arith.constant dense<0.000000e+00> : vector<32x32xf32>
    %123 = tpu.matmul %122, %12, %cst_73 {dimension_numbers = #tpu.dot_dimension_numbers<[1], [0], [0], [1], [0, 0, 1, 1], [], []>} : vector<32x32xbf16>, vector<32x32xbf16>, vector<32x32xf32> -> vector<32x32xf32>
    %124 = vector.broadcast %26 : vector<1x32xf32> to vector<32x32xf32>
    %125 = arith.addf %123, %124 : vector<32x32xf32>
    %126 = arith.addf %92, %125 : vector<32x32xf32>
    %cst_74 = arith.constant dense<0.000000e+00> : vector<32xf32>
    %127 = vector.multi_reduction <add>, %126, %cst_74 [0] : vector<32x32xf32> to vector<32xf32>
    %128 = vector.shape_cast %127 : vector<32xf32> to vector<1x32xf32>
    %cst_75 = arith.constant 3.200000e+01 : f32
    %129 = vector.broadcast %cst_75 : f32 to vector<1x32xf32>
    %130 = arith.divf %128, %129 : vector<1x32xf32>
    %131 = vector.broadcast %130 : vector<1x32xf32> to vector<32x32xf32>
    %132 = arith.subf %126, %131 : vector<32x32xf32>
    %133 = arith.mulf %132, %132 : vector<32x32xf32>
    %cst_76 = arith.constant dense<0.000000e+00> : vector<32xf32>
    %134 = vector.multi_reduction <add>, %133, %cst_76 [0] : vector<32x32xf32> to vector<32xf32>
    %135 = vector.shape_cast %134 : vector<32xf32> to vector<1x32xf32>
    %cst_77 = arith.constant 3.200000e+01 : f32
    %136 = vector.broadcast %cst_77 : f32 to vector<1x32xf32>
    %137 = arith.divf %135, %136 : vector<1x32xf32>
    %cst_78 = arith.constant 9.99999974E-6 : f32
    %138 = vector.broadcast %cst_78 : f32 to vector<1x32xf32>
    %139 = arith.addf %137, %138 : vector<1x32xf32>
    %140 = math.rsqrt %139 : vector<1x32xf32>
    %141 = vector.broadcast %140 : vector<1x32xf32> to vector<32x32xf32>
    %142 = arith.mulf %132, %141 : vector<32x32xf32>
    %143 = vector.broadcast %36 : vector<1x32xf32> to vector<32x32xf32>
    %144 = arith.mulf %143, %142 : vector<32x32xf32>
    %145 = vector.broadcast %38 : vector<1x32xf32> to vector<32x32xf32>
    %146 = arith.addf %144, %145 : vector<32x32xf32>
    %c1_79 = arith.constant 1 : index
    %c0_80 = arith.constant 0 : index
    %c0_81 = arith.constant 0 : index
    %c0_82 = arith.constant 0 : index
    %147 = vector.load %arg3[%c1_79, %c0_80, %c0_81, %c0_82] : memref<2x5x32x32xbf16, #tpu.memory_space<vmem>>, vector<1x1x32x32xbf16>
    %148 = vector.shape_cast %147 : vector<1x1x32x32xbf16> to vector<32x32xbf16>
    %c1_83 = arith.constant 1 : index
    %c1_84 = arith.constant 1 : index
    %c0_85 = arith.constant 0 : index
    %c0_86 = arith.constant 0 : index
    %149 = vector.load %arg3[%c1_83, %c1_84, %c0_85, %c0_86] : memref<2x5x32x32xbf16, #tpu.memory_space<vmem>>, vector<1x1x32x32xbf16>
    %150 = vector.shape_cast %149 : vector<1x1x32x32xbf16> to vector<32x32xbf16>
    %c1_87 = arith.constant 1 : index
    %c2_88 = arith.constant 2 : index
    %c0_89 = arith.constant 0 : index
    %c0_90 = arith.constant 0 : index
    %151 = vector.load %arg3[%c1_87, %c2_88, %c0_89, %c0_90] : memref<2x5x32x32xbf16, #tpu.memory_space<vmem>>, vector<1x1x32x32xbf16>
    %152 = vector.shape_cast %151 : vector<1x1x32x32xbf16> to vector<32x32xbf16>
    %c1_91 = arith.constant 1 : index
    %c3_92 = arith.constant 3 : index
    %c0_93 = arith.constant 0 : index
    %c0_94 = arith.constant 0 : index
    %153 = vector.load %arg3[%c1_91, %c3_92, %c0_93, %c0_94] : memref<2x5x32x32xbf16, #tpu.memory_space<vmem>>, vector<1x1x32x32xbf16>
    %154 = vector.shape_cast %153 : vector<1x1x32x32xbf16> to vector<32x32xbf16>
    %c1_95 = arith.constant 1 : index
    %c4_96 = arith.constant 4 : index
    %c0_97 = arith.constant 0 : index
    %c0_98 = arith.constant 0 : index
    %155 = vector.load %arg3[%c1_95, %c4_96, %c0_97, %c0_98] : memref<2x5x32x32xbf16, #tpu.memory_space<vmem>>, vector<1x1x32x32xbf16>
    %156 = vector.shape_cast %155 : vector<1x1x32x32xbf16> to vector<32x32xbf16>
    %c1_99 = arith.constant 1 : index
    %c0_100 = arith.constant 0 : index
    %c0_101 = arith.constant 0 : index
    %157 = vector.load %arg4[%c1_99, %c0_100, %c0_101] : memref<2x2x32xf32, #tpu.memory_space<vmem>>, vector<1x2x32xf32>
    %158 = vector.shape_cast %157 : vector<1x2x32xf32> to vector<2x32xf32>
    %c1_102 = arith.constant 1 : index
    %c0_103 = arith.constant 0 : index
    %c0_104 = arith.constant 0 : index
    %159 = vector.load %arg5[%c1_102, %c0_103, %c0_104] : memref<2x12x32xf32, #tpu.memory_space<vmem>>, vector<1x1x32xf32>
    %160 = vector.shape_cast %159 : vector<1x1x32xf32> to vector<1x32xf32>
    %c1_105 = arith.constant 1 : index
    %c1_106 = arith.constant 1 : index
    %c0_107 = arith.constant 0 : index
    %161 = vector.load %arg5[%c1_105, %c1_106, %c0_107] : memref<2x12x32xf32, #tpu.memory_space<vmem>>, vector<1x1x32xf32>
    %162 = vector.shape_cast %161 : vector<1x1x32xf32> to vector<1x32xf32>
    %c1_108 = arith.constant 1 : index
    %c2_109 = arith.constant 2 : index
    %c0_110 = arith.constant 0 : index
    %163 = vector.load %arg5[%c1_108, %c2_109, %c0_110] : memref<2x12x32xf32, #tpu.memory_space<vmem>>, vector<1x1x32xf32>
    %164 = vector.shape_cast %163 : vector<1x1x32xf32> to vector<1x32xf32>
    %c1_111 = arith.constant 1 : index
    %c3_112 = arith.constant 3 : index
    %c0_113 = arith.constant 0 : index
    %165 = vector.load %arg5[%c1_111, %c3_112, %c0_113] : memref<2x12x32xf32, #tpu.memory_space<vmem>>, vector<1x1x32xf32>
    %166 = vector.shape_cast %165 : vector<1x1x32xf32> to vector<1x32xf32>
    %c1_114 = arith.constant 1 : index
    %c4_115 = arith.constant 4 : index
    %c0_116 = arith.constant 0 : index
    %167 = vector.load %arg5[%c1_114, %c4_115, %c0_116] : memref<2x12x32xf32, #tpu.memory_space<vmem>>, vector<1x1x32xf32>
    %168 = vector.shape_cast %167 : vector<1x1x32xf32> to vector<1x32xf32>
    %c1_117 = arith.constant 1 : index
    %c5_118 = arith.constant 5 : index
    %c0_119 = arith.constant 0 : index
    %169 = vector.load %arg5[%c1_117, %c5_118, %c0_119] : memref<2x12x32xf32, #tpu.memory_space<vmem>>, vector<1x1x32xf32>
    %170 = vector.shape_cast %169 : vector<1x1x32xf32> to vector<1x32xf32>
    %c1_120 = arith.constant 1 : index
    %c6_121 = arith.constant 6 : index
    %c0_122 = arith.constant 0 : index
    %171 = vector.load %arg5[%c1_120, %c6_121, %c0_122] : memref<2x12x32xf32, #tpu.memory_space<vmem>>, vector<1x1x32xf32>
    %172 = vector.shape_cast %171 : vector<1x1x32xf32> to vector<1x32xf32>
    %c1_123 = arith.constant 1 : index
    %c7_124 = arith.constant 7 : index
    %c0_125 = arith.constant 0 : index
    %173 = vector.load %arg5[%c1_123, %c7_124, %c0_125] : memref<2x12x32xf32, #tpu.memory_space<vmem>>, vector<1x1x32xf32>
    %174 = vector.shape_cast %173 : vector<1x1x32xf32> to vector<1x32xf32>
    %c1_126 = arith.constant 1 : index
    %c8_127 = arith.constant 8 : index
    %c0_128 = arith.constant 0 : index
    %175 = vector.load %arg5[%c1_126, %c8_127, %c0_128] : memref<2x12x32xf32, #tpu.memory_space<vmem>>, vector<1x1x32xf32>
    %176 = vector.shape_cast %175 : vector<1x1x32xf32> to vector<1x32xf32>
    %c1_129 = arith.constant 1 : index
    %c9_130 = arith.constant 9 : index
    %c0_131 = arith.constant 0 : index
    %177 = vector.load %arg5[%c1_129, %c9_130, %c0_131] : memref<2x12x32xf32, #tpu.memory_space<vmem>>, vector<1x1x32xf32>
    %178 = vector.shape_cast %177 : vector<1x1x32xf32> to vector<1x32xf32>
    %c1_132 = arith.constant 1 : index
    %c10_133 = arith.constant 10 : index
    %c0_134 = arith.constant 0 : index
    %179 = vector.load %arg5[%c1_132, %c10_133, %c0_134] : memref<2x12x32xf32, #tpu.memory_space<vmem>>, vector<1x1x32xf32>
    %180 = vector.shape_cast %179 : vector<1x1x32xf32> to vector<1x32xf32>
    %c1_135 = arith.constant 1 : index
    %c11_136 = arith.constant 11 : index
    %c0_137 = arith.constant 0 : index
    %181 = vector.load %arg5[%c1_135, %c11_136, %c0_137] : memref<2x12x32xf32, #tpu.memory_space<vmem>>, vector<1x1x32xf32>
    %182 = vector.shape_cast %181 : vector<1x1x32xf32> to vector<1x32xf32>
    %cst_138 = arith.constant dense<0.000000e+00> : vector<32x32xf32>
    %183 = tpu.matmul %1, %158, %cst_138 {dimension_numbers = #tpu.dot_dimension_numbers<[1], [0], [0], [1], [0, 0, 1, 1], [], []>} : vector<32x2xf32>, vector<2x32xf32>, vector<32x32xf32> -> vector<32x32xf32>
    %184 = vector.broadcast %166 : vector<1x32xf32> to vector<32x32xf32>
    %185 = arith.addf %183, %184 : vector<32x32xf32>
    %186 = arith.addf %146, %185 : vector<32x32xf32>
    %187 = arith.truncf %186 : vector<32x32xf32> to vector<32x32xbf16>
    %cst_139 = arith.constant dense<0.000000e+00> : vector<32x32xf32>
    %188 = tpu.matmul %187, %148, %cst_139 {dimension_numbers = #tpu.dot_dimension_numbers<[1], [0], [0], [1], [0, 0, 1, 1], [], []>} : vector<32x32xbf16>, vector<32x32xbf16>, vector<32x32xf32> -> vector<32x32xf32>
    %189 = vector.broadcast %160 : vector<1x32xf32> to vector<32x32xf32>
    %190 = arith.addf %188, %189 : vector<32x32xf32>
    %191 = arith.truncf %186 : vector<32x32xf32> to vector<32x32xbf16>
    %cst_140 = arith.constant dense<0.000000e+00> : vector<32x32xf32>
    %192 = tpu.matmul %191, %150, %cst_140 {dimension_numbers = #tpu.dot_dimension_numbers<[1], [0], [0], [1], [0, 0, 1, 1], [], []>} : vector<32x32xbf16>, vector<32x32xbf16>, vector<32x32xf32> -> vector<32x32xf32>
    %193 = vector.broadcast %162 : vector<1x32xf32> to vector<32x32xf32>
    %194 = arith.addf %192, %193 : vector<32x32xf32>
    %195 = arith.truncf %146 : vector<32x32xf32> to vector<32x32xbf16>
    %cst_141 = arith.constant dense<0.000000e+00> : vector<32x32xf32>
    %196 = tpu.matmul %195, %152, %cst_141 {dimension_numbers = #tpu.dot_dimension_numbers<[1], [0], [0], [1], [0, 0, 1, 1], [], []>} : vector<32x32xbf16>, vector<32x32xbf16>, vector<32x32xf32> -> vector<32x32xf32>
    %197 = vector.broadcast %164 : vector<1x32xf32> to vector<32x32xf32>
    %198 = arith.addf %196, %197 : vector<32x32xf32>
    %199 = arith.truncf %190 : vector<32x32xf32> to vector<32x32xbf16>
    %200 = arith.truncf %194 : vector<32x32xf32> to vector<32x32xbf16>
    %cst_142 = arith.constant dense<0.000000e+00> : vector<32x32xf32>
    %201 = tpu.matmul %199, %200, %cst_142 {dimension_numbers = #tpu.dot_dimension_numbers<[1], [1], [0], [0], [0, 0, 1, 0], [], []>} : vector<32x32xbf16>, vector<32x32xbf16>, vector<32x32xf32> -> vector<32x32xf32>
    %202 = arith.addf %201, %2 : vector<32x32xf32>
    %cst_143 = arith.constant dense<0xFF800000> : vector<32xf32>
    %203 = vector.multi_reduction <maximumf>, %202, %cst_143 [1] : vector<32x32xf32> to vector<32xf32>
    %204 = vector.shape_cast %203 : vector<32xf32> to vector<32x1xf32>
    %205 = vector.broadcast %204 : vector<32x1xf32> to vector<32x32xf32>
    %206 = arith.subf %202, %205 : vector<32x32xf32>
    %207 = math.exp %206 : vector<32x32xf32>
    %cst_144 = arith.constant dense<0.000000e+00> : vector<32xf32>
    %208 = vector.multi_reduction <add>, %207, %cst_144 [1] : vector<32x32xf32> to vector<32xf32>
    %209 = vector.shape_cast %208 : vector<32xf32> to vector<32x1xf32>
    %210 = tpu.reciprocal %209 {approx = true} : vector<32x1xf32> -> vector<32x1xf32>
    %211 = vector.broadcast %210 : vector<32x1xf32> to vector<32x32xf32>
    %212 = arith.mulf %207, %211 : vector<32x32xf32>
    %213 = arith.truncf %212 : vector<32x32xf32> to vector<32x32xbf16>
    %214 = arith.truncf %198 : vector<32x32xf32> to vector<32x32xbf16>
    %cst_145 = arith.constant dense<0.000000e+00> : vector<32x32xf32>
    %215 = tpu.matmul %213, %214, %cst_145 {dimension_numbers = #tpu.dot_dimension_numbers<[1], [0], [0], [1], [0, 0, 1, 1], [], []>} : vector<32x32xbf16>, vector<32x32xbf16>, vector<32x32xf32> -> vector<32x32xf32>
    %216 = arith.addf %146, %215 : vector<32x32xf32>
    %cst_146 = arith.constant dense<0.000000e+00> : vector<32xf32>
    %217 = vector.multi_reduction <add>, %216, %cst_146 [0] : vector<32x32xf32> to vector<32xf32>
    %218 = vector.shape_cast %217 : vector<32xf32> to vector<1x32xf32>
    %cst_147 = arith.constant 3.200000e+01 : f32
    %219 = vector.broadcast %cst_147 : f32 to vector<1x32xf32>
    %220 = arith.divf %218, %219 : vector<1x32xf32>
    %221 = vector.broadcast %220 : vector<1x32xf32> to vector<32x32xf32>
    %222 = arith.subf %216, %221 : vector<32x32xf32>
    %223 = arith.mulf %222, %222 : vector<32x32xf32>
    %cst_148 = arith.constant dense<0.000000e+00> : vector<32xf32>
    %224 = vector.multi_reduction <add>, %223, %cst_148 [0] : vector<32x32xf32> to vector<32xf32>
    %225 = vector.shape_cast %224 : vector<32xf32> to vector<1x32xf32>
    %cst_149 = arith.constant 3.200000e+01 : f32
    %226 = vector.broadcast %cst_149 : f32 to vector<1x32xf32>
    %227 = arith.divf %225, %226 : vector<1x32xf32>
    %cst_150 = arith.constant 9.99999974E-6 : f32
    %228 = vector.broadcast %cst_150 : f32 to vector<1x32xf32>
    %229 = arith.addf %227, %228 : vector<1x32xf32>
    %230 = math.rsqrt %229 : vector<1x32xf32>
    %231 = vector.broadcast %230 : vector<1x32xf32> to vector<32x32xf32>
    %232 = arith.mulf %222, %231 : vector<32x32xf32>
    %233 = vector.broadcast %172 : vector<1x32xf32> to vector<32x32xf32>
    %234 = arith.mulf %233, %232 : vector<32x32xf32>
    %235 = vector.broadcast %174 : vector<1x32xf32> to vector<32x32xf32>
    %236 = arith.addf %234, %235 : vector<32x32xf32>
    %237 = arith.truncf %236 : vector<32x32xf32> to vector<32x32xbf16>
    %cst_151 = arith.constant dense<0.000000e+00> : vector<32x32xf32>
    %238 = tpu.matmul %237, %154, %cst_151 {dimension_numbers = #tpu.dot_dimension_numbers<[1], [0], [0], [1], [0, 0, 1, 1], [], []>} : vector<32x32xbf16>, vector<32x32xbf16>, vector<32x32xf32> -> vector<32x32xf32>
    %239 = vector.broadcast %168 : vector<1x32xf32> to vector<32x32xf32>
    %240 = arith.addf %238, %239 : vector<32x32xf32>
    %cst_152 = arith.constant dense<0.000000e+00> : vector<32xf32>
    %241 = vector.multi_reduction <add>, %240, %cst_152 [0] : vector<32x32xf32> to vector<32xf32>
    %242 = vector.shape_cast %241 : vector<32xf32> to vector<1x32xf32>
    %cst_153 = arith.constant 3.200000e+01 : f32
    %243 = vector.broadcast %cst_153 : f32 to vector<1x32xf32>
    %244 = arith.divf %242, %243 : vector<1x32xf32>
    %245 = vector.broadcast %244 : vector<1x32xf32> to vector<32x32xf32>
    %246 = arith.subf %240, %245 : vector<32x32xf32>
    %247 = arith.mulf %246, %246 : vector<32x32xf32>
    %cst_154 = arith.constant dense<0.000000e+00> : vector<32xf32>
    %248 = vector.multi_reduction <add>, %247, %cst_154 [0] : vector<32x32xf32> to vector<32xf32>
    %249 = vector.shape_cast %248 : vector<32xf32> to vector<1x32xf32>
    %cst_155 = arith.constant 3.200000e+01 : f32
    %250 = vector.broadcast %cst_155 : f32 to vector<1x32xf32>
    %251 = arith.divf %249, %250 : vector<1x32xf32>
    %cst_156 = arith.constant 9.99999974E-6 : f32
    %252 = vector.broadcast %cst_156 : f32 to vector<1x32xf32>
    %253 = arith.addf %251, %252 : vector<1x32xf32>
    %254 = math.rsqrt %253 : vector<1x32xf32>
    %255 = vector.broadcast %254 : vector<1x32xf32> to vector<32x32xf32>
    %256 = arith.mulf %246, %255 : vector<32x32xf32>
    %257 = vector.broadcast %176 : vector<1x32xf32> to vector<32x32xf32>
    %258 = arith.mulf %257, %256 : vector<32x32xf32>
    %259 = vector.broadcast %178 : vector<1x32xf32> to vector<32x32xf32>
    %260 = arith.addf %258, %259 : vector<32x32xf32>
    %cst_157 = arith.constant 0.000000e+00 : f32
    %261 = vector.broadcast %cst_157 : f32 to vector<32x32xf32>
    %262 = arith.cmpf oge, %260, %261 : vector<32x32xf32>
    %cst_158 = arith.constant 0.00999999977 : f32
    %263 = vector.broadcast %cst_158 : f32 to vector<32x32xf32>
    %264 = arith.mulf %263, %260 : vector<32x32xf32>
    %265 = arith.select %262, %260, %264 : vector<32x32xi1>, vector<32x32xf32>
    %266 = arith.truncf %265 : vector<32x32xf32> to vector<32x32xbf16>
    %cst_159 = arith.constant dense<0.000000e+00> : vector<32x32xf32>
    %267 = tpu.matmul %266, %156, %cst_159 {dimension_numbers = #tpu.dot_dimension_numbers<[1], [0], [0], [1], [0, 0, 1, 1], [], []>} : vector<32x32xbf16>, vector<32x32xbf16>, vector<32x32xf32> -> vector<32x32xf32>
    %268 = vector.broadcast %170 : vector<1x32xf32> to vector<32x32xf32>
    %269 = arith.addf %267, %268 : vector<32x32xf32>
    %270 = arith.addf %236, %269 : vector<32x32xf32>
    %cst_160 = arith.constant dense<0.000000e+00> : vector<32xf32>
    %271 = vector.multi_reduction <add>, %270, %cst_160 [0] : vector<32x32xf32> to vector<32xf32>
    %272 = vector.shape_cast %271 : vector<32xf32> to vector<1x32xf32>
    %cst_161 = arith.constant 3.200000e+01 : f32
    %273 = vector.broadcast %cst_161 : f32 to vector<1x32xf32>
    %274 = arith.divf %272, %273 : vector<1x32xf32>
    %275 = vector.broadcast %274 : vector<1x32xf32> to vector<32x32xf32>
    %276 = arith.subf %270, %275 : vector<32x32xf32>
    %277 = arith.mulf %276, %276 : vector<32x32xf32>
    %cst_162 = arith.constant dense<0.000000e+00> : vector<32xf32>
    %278 = vector.multi_reduction <add>, %277, %cst_162 [0] : vector<32x32xf32> to vector<32xf32>
    %279 = vector.shape_cast %278 : vector<32xf32> to vector<1x32xf32>
    %cst_163 = arith.constant 3.200000e+01 : f32
    %280 = vector.broadcast %cst_163 : f32 to vector<1x32xf32>
    %281 = arith.divf %279, %280 : vector<1x32xf32>
    %cst_164 = arith.constant 9.99999974E-6 : f32
    %282 = vector.broadcast %cst_164 : f32 to vector<1x32xf32>
    %283 = arith.addf %281, %282 : vector<1x32xf32>
    %284 = math.rsqrt %283 : vector<1x32xf32>
    %285 = vector.broadcast %284 : vector<1x32xf32> to vector<32x32xf32>
    %286 = arith.mulf %276, %285 : vector<32x32xf32>
    %287 = vector.broadcast %180 : vector<1x32xf32> to vector<32x32xf32>
    %288 = arith.mulf %287, %286 : vector<32x32xf32>
    %289 = vector.broadcast %182 : vector<1x32xf32> to vector<32x32xf32>
    %290 = arith.addf %288, %289 : vector<32x32xf32>
    %c0_165 = arith.constant 0 : index
    %c0_166 = arith.constant 0 : index
    %291 = vector.load %arg6[%c0_165, %c0_166] : memref<32x32xf32, #tpu.memory_space<vmem>>, vector<32x32xf32>
    tpu.vector_store %arg6[%c0_165, %c0_166], %290 {strides = array<i32>} : memref<32x32xf32, #tpu.memory_space<vmem>>, vector<32x32xf32>,
    return
  }
}

</mosaic_0001>

<bundles_post_ra>
// kernel: spatial_transformer_encoder.1
= control target key start
LH: loop header
LB: loop body
LE: loop exit
PB: predicated region body
PF: predicated region fallthrough
CT: control target
= control target key end

     0   :  { %11 = vsyncpa [#allocation3], 0  ;;  %s2587_s0 = inlined_call_operand.vmem [shape: f32[32,32], index: 0, kind: input, shape index: {}]   ;;  %s2588_s1 = inlined_call_operand.vmem [shape: f32[32,2], index: 1, kind: input, shape index: {}]   ;;  %s2589_s2 = inlined_call_operand.vmem [shape: f32[32,32], index: 2, kind: input, shape index: {}]   ;;  %s2590_s3 = inlined_call_operand.hbm [shape: bf16[2,5,32,32], index: 3, kind: input, shape index: {}]   ;;  %s2591_s4 = inlined_call_operand.vmem [shape: f32[2,2,32], index: 4, kind: input, shape index: {}]   ;;  %s2592_s5 = inlined_call_operand.vmem [shape: f32[2,12,32], index: 5, kind: input, shape index: {}]   ;;  %s2593_s6 = inlined_call_operand.hbm [shape: f32[32,32], index: 6, kind: output, shape index: {}]  }
   0x1   :  { %12 = vsyncpa [#allocation4], 0  ;;  %s2202_s21 = smov [#allocation2]  }
   0x2   :  { %s24_s22 = sshll.u32 %s2202_s21, 4  ;;  %s25_s22 = int_to_ptr.vmem [resolvable:$true] %s24_s22 }
   0x3   :  { %s2166_s23 = scalar_lea.vmem %s25_s22, 2560  ;;  %p2171_p1 = scmp.lt.s32.totalorder %s25_s22, %s25_s22 }
   0x4   :  { %p2167_p0 = scmp.ne.s32.totalorder %s25_s22, %s2166_s23  ;;  %p2172_p2 = scmp.lt.s32.totalorder %s2166_s23, %s2166_s23 }
   0x6   :  { %p2173_p3 = por %p2172_p2, %p2171_p1 }
   0x8   :  { %p2174_p4 = pnand %p2173_p3, %p2167_p0 }
   0xa   :  { %2177 = shalt.err (!%p2174_p4)
}
   0xb   :  { %s2203_s24 = smov 64   ;;  %s2204_s25 = smov 4  }
   0xc   :  { %30 = dma.hbm_to_vmem [thread:$0]  %s2590_s3, 2560, %s25_s22, [#allocation3], %s2203_s24, %s2203_s24, %s2204_s25  }
   0xd   :  { %2198 = dma.done.wait [#allocation3], 2560  }
   0xe   :  { %2199 = vsyncadd [#allocation3], 4294964736  ;;  %vm105_vm0 = vcmask 1041408   ;;  %vm92_vm1 = vcmask 15360   ;;  %v75_v0 = vld [vmem:[%s2591_s4] sm:$0x3] }
   0xf   :  { %v2252_v1 = vld [vmem:[%s2588_s1] sm:$0xff]  ;;  %v2257_v2 = vld [vmem:[%s2588_s1 + $0x8] sm:$0xff]  ;;  %1956 = vmatprep.subr.msk.mxu0 %vm105_vm0, %v75_v0  ;;  %v2265_v3 = vld [vmem:[%s2588_s1 + $0x10] sm:$0xff]  ;;  %vm216_vm2 = vcmask 261120   ;;  %s2205_s20 = smov [#allocation5]  }
  0x10   :  { %1958 = vmatprep.mubr.msk.f32.mxu0 %vm92_vm1, %v2252_v1  ;;  %1957 = vmatpush3.msk.msra.mxu0 %vm105_vm0, %v75_v0  ;;  %v2271_v4 = vld [vmem:[%s2588_s1 + $0x18] sm:$0xff]  ;;  %v2095_v6 = vld [vmem:[#allocation2 + $0x8] sm:$0xff]   ;;  %v2096_v7 = vld [vmem:[#allocation2 + $0x10] sm:$0xff]   ;;  %s1783_s21 = sshll.u32 %s2205_s20, 4  ;;  %s1784_s21 = int_to_ptr.vmem [resolvable:$true] %s1783_s21 }
  0x11   :  { %1959 = vmatmul.mubr.msk.f32.vlgmr.msra.gmra.mxu0 %vm92_vm1, %v2257_v2  ;;  %v2094_v5 = vld [vmem:[#allocation2 + $0x18] sm:$0xff]   ;;  %1964 = vmatprep.subr.bf16.mxu1 %v2095_v6  ;;  %v2097_v8 = vld [vmem:[#allocation2] sm:$0xff]   ;;  %v2285_v12 = vld [vmem:[%s2587_s0 + $0x8] sm:$0xff]  ;;  %p2183_p6 = scmp.lt.s32.totalorder %s1784_s21, %s1784_s21 }
  0x12   :  { %1961 = vmatprep.mubr.msk.f32.mxu0 %vm92_vm1, %v2265_v3  ;;  %1972 = vmatprep.subr.bf16.mxu0 %v2094_v5  ;;  %v1795_v9 = vld [vmem:[%s2592_s5 + $0x3] ss:$0 sm:$0xff]  ;;  %v2297_v20 = vld [vmem:[%s2587_s0 + $0x18] sm:$0xff]  ;;  %v2302_v21 = vld [vmem:[%s2587_s0 + $0x10] sm:$0xff] }
  0x13   :  { %1973 = vmatpush3.bf16.msra.mxu0 %v2094_v5  ;;  %1965 = vmatpush3.bf16.msra.mxu1 %v2095_v6  ;;  %v2290_v13 = vld [vmem:[%s2587_s0] sm:$0xff]  ;;  %v2098_v53 = vld [vmem:[#allocation2 + $0x28] sm:$0xff]   ;;  %v338_v55 = vpack.c.bf16 %v2297_v20, %v2302_v21  ;;  %v2331_v56 = vld [vmem:[%s2589_s2 + $0x10] sm:$0xff] }
  0x14   :  { %1974 = vmatprep.subr.bf16.mxu0 %v2096_v7  ;;  %1966 = vmatprep.subr.bf16.mxu1 %v2097_v8  ;;  %v337_v27 = vpack.c.bf16 %v2285_v12, %v2290_v13  ;;  %v1806_v31 = vld [vmem:[%s2592_s5 + $0x1] ss:$0 sm:$0xff]  ;;  %v1801_v36 = vld [vmem:[%s2592_s5] ss:$0 sm:$0xff]  ;;  %v2342_v61 = vld [vmem:[%s2589_s2 + $0x18] sm:$0xff] }
  0x15   :  { %1962 = vmatmul.mubr.msk.f32.gmra.mxu0 %vm92_vm1, %v2271_v4  ;;  %v2099_v54 = vld [vmem:[#allocation2 + $0x20] sm:$0xff]   ;;  %v2349_v5 = vld [vmem:[%s2589_s2 + $0x8] sm:$0xff] }
  0x16   :  { %v2336_v58 = vld [vmem:[%s2589_s2] sm:$0xff] }
  0x17   :  { %1975 = vmatpush3.bf16.msra.mxu0 %v2096_v7  ;;  %1967 = vmatpush3.bf16.msra.mxu1 %v2097_v8 }
  0x18   :  { %1980 = vmatprep.subr.bf16.mxu1 %v2098_v53 }
  0xd1   :  { %v1960_v10 = vpop.f32.mrf.mxu0 }
  0xd2   :  { %v181_v11 = vadd.f32 %v1960_v10, %v1795_v9 }
  0xd3   :  { %v175_v14 = vpop.f32.mrf.mxu0 }
  0xd4   :  { %v176_v15 = vadd.f32 %v1795_v9, %v175_v14  ;;  %v195_v17 = vadd.f32 %v181_v11, %v2285_v12 }
  0xd5   :  { %v1963_v16 = vpop.f32.mrf.mxu0 }
  0xd6   :  { %v194_v18 = vadd.f32 %v176_v15, %v2290_v13  ;;  %v191_v19 = vadd.f32 %v1963_v16, %v1795_v9 }
  0xd7   :  { %v185_v22 = vpop.f32.mrf.mxu0 }
  0xd8   :  { %v186_v23 = vadd.f32 %v1795_v9, %v185_v22  ;;  %v198_v24 = vpack.c.bf16 %v195_v17, %v194_v18  ;;  %v197_v25 = vadd.f32 %v191_v19, %v2297_v20 }
  0xda   :  { %v196_v26 = vadd.f32 %v186_v23, %v2302_v21  ;;  %1968 = vmatprep.mubr.msk.bf16.mxu1 %vm216_vm2, %v198_v24  ;;  %1976 = vmatprep.mubr.msk.bf16.mxu0 %vm216_vm2, %v198_v24 }
  0xdc   :  { %v199_v28 = vpack.c.bf16 %v197_v25, %v196_v26 }
  0xde   :  { %1969 = vmatmul.mubr.msk.bf16.vlgmr.msra.gmra.mxu1 %vm216_vm2, %v199_v28  ;;  %1977 = vmatmul.mubr.msk.bf16.vlgmr.msra.gmra.mxu0 %vm216_vm2, %v199_v28 }
  0xdf   :  { %1984 = vmatprep.mubr.msk.bf16.mxu1 %vm216_vm2, %v337_v27  ;;  %1981 = vmatpush3.bf16.msra.mxu1 %v2098_v53 }
  0xe0   :  { %1982 = vmatprep.subr.bf16.mxu1 %v2099_v54 }
  0xe3   :  { %1983 = vmatpush3.bf16.msra.mxu1 %v2099_v54 }
  0xe6   :  { %1985 = vmatmul.mubr.msk.bf16.vlgmr.msra.gmra.mxu1 %vm216_vm2, %v338_v55 }
 0x19e   :  { %v1970_v29 = vpop.f32.mrf.mxu1  ;;  %v1978_v30 = vpop.f32.mrf.mxu0 }
 0x19f   :  { %v331_v37 = vadd.f32 %v1978_v30, %v1806_v31  ;;  %v266_v51 = vadd.f32 %v1970_v29, %v1801_v36 }
 0x1a0   :  { %v257_v32 = vpop.f32.mrf.mxu1  ;;  %v322_v33 = vpop.f32.mrf.mxu0 }
 0x1a1   :  { %v258_v39 = vadd.f32 %v1801_v36, %v257_v32  ;;  %v323_v42 = vadd.f32 %v1806_v31, %v322_v33 }
 0x1a2   :  { %v1971_v34 = vpop.f32.mrf.mxu1  ;;  %v1979_v35 = vpop.f32.mrf.mxu0 }
 0x1a3   :  { %v334_v38 = vadd.f32 %v1979_v35, %v1806_v31  ;;  %v269_v50 = vadd.f32 %v1971_v34, %v1801_v36 }
 0x1a4   :  { %v260_v40 = vpop.f32.mrf.mxu1  ;;  %v325_v41 = vpop.f32.mrf.mxu0 }
 0x1a5   :  { %v413_v43 = vpack.c.bf16 %v334_v38, %v331_v37  ;;  %v261_v44 = vadd.f32 %v1801_v36, %v260_v40  ;;  %v326_v45 = vadd.f32 %v1806_v31, %v325_v41  ;;  %v411_v52 = vpack.c.bf16 %v269_v50, %v266_v51  ;;  %v1811_v37 = vld [vmem:[%s2592_s5 + $0x2] ss:$0 sm:$0xff] }
 0x1a6   :  { %v1986_v35 = vpop.f32.mrf.mxu1 }
 0x1a7   :  { %v410_v46 = vpack.c.bf16 %v261_v44, %v258_v39  ;;  %v412_v47 = vpack.c.bf16 %v326_v45, %v323_v42  ;;  %2084 = vmatprep.subr.msk.bf16.mxu0 %vm216_vm2, %v413_v43  ;;  %v424_v48 = vsel %vm216_vm2, %v413_v43, 0  ;;  %v404_v39 = vadd.f32 %v1986_v35, %v1811_v37 }
 0x1a8   :  { %1989 = vmatpush3.bf16.xpose.msra.mxu0 %v424_v48  ;;  %v395_v38 = vpop.f32.mrf.mxu1 }
 0x1a9   :  { %2085 = vmatprep.subr.msk.bf16.mxu0 %vm216_vm2, %v412_v47  ;;  %1992 = vmatprep.mubr.msk.bf16.mxu0 %vm216_vm2, %v410_v46  ;;  %v421_v49 = vsel %vm216_vm2, %v412_v47, 0  ;;  %v396_v42 = vadd.f32 %v1811_v37, %v395_v38 }
 0x1aa   :  { %v1987_v40 = vpop.f32.mrf.mxu1 }
 0x1ab   :  { %v407_v41 = vadd.f32 %v1987_v40, %v1811_v37 }
 0x1ac   :  { %v398_v44 = vpop.f32.mrf.mxu1 }
 0x1ad   :  { %v522_v43 = vpack.c.bf16 %v407_v41, %v404_v39  ;;  %v399_v45 = vadd.f32 %v1811_v37, %v398_v44 }
 0x1af   :  { %1996 = vmatprep.subr.bf16.mxu1 %v522_v43  ;;  %v521_v46 = vpack.c.bf16 %v399_v45, %v396_v42 }
 0x1b0   :  { %1991 = vmatpush3.bf16.xpose.msra.mxu0 %v421_v49  ;;  %1997 = vmatpush3.bf16.msra.mxu1 %v522_v43 }
 0x1b1   :  { %1998 = vmatprep.subr.bf16.mxu1 %v521_v46 }
 0x1b4   :  { %1999 = vmatpush3.bf16.msra.mxu1 %v521_v46 }
 0x1b7   :  { %1993 = vmatmul.mubr.msk.bf16.vlgmr.msra.gmra.mxu0 %vm216_vm2, %v411_v52 }
 0x277   :  { %v1994_v57 = vpop.f32.mrf.mxu0 }
 0x278   :  { %v469_v59 = vadd.f32 %v1994_v57, %v2331_v56 }
 0x279   :  { %v460_v60 = vpop.f32.mrf.mxu0 }
 0x27a   :  { %v461_v62 = vadd.f32 %v460_v60, %v2336_v58  ;;  %v481_v63 = vsel %vm216_vm2, %v469_v59, -inf }
 0x27b   :  { %482 = vmax.xlane.f32.xlu1 %v481_v63  ;;  %v1995_v0 = vpop.f32.mrf.mxu0 }
 0x27c   :  { %v472_v6 = vadd.f32 %v1995_v0, %v2342_v61  ;;  %v475_v7 = vsel %vm216_vm2, %v461_v62, -inf  ;;  %v2100_v0 = vld [vmem:[#allocation2 + $0x38] sm:$0xff]  }
 0x27d   :  { %v463_v8 = vpop.f32.mrf.mxu0  ;;  %476 = vmax.xlane.f32.xlu0 %v475_v7  ;;  %2004 = vmatprep.subr.bf16.mxu1 %v2100_v0 }
 0x27e   :  { %v464_v9 = vadd.f32 %v463_v8, %v2349_v5  ;;  %v484_v10 = vsel %vm216_vm2, %v472_v6, -inf }
 0x27f   :  { %485 = vmax.xlane.f32.xlu1 %v484_v10 }
 0x280   :  { %v478_v11 = vsel %vm216_vm2, %v464_v9, -inf }
 0x281   :  { %479 = vmax.xlane.f32.xlu0 %v478_v11 }
 0x304   :  { %v483_v14 = vpop.xlane.xlu1 %482 }
 0x305   :  { %v489_v15 = vsub.f32 %v469_v59, %v483_v14 }
 0x306   :  { %v477_v16 = vpop.xlane.xlu0 %476 }
 0x307   :  { %v487_v17 = vsub.f32 %v461_v62, %v477_v16  ;;  %v495_v19 = vmul.f32 1.442695, %v489_v15 }
 0x308   :  { %v486_v18 = vpop.xlane.xlu1 %485 }
 0x309   :  { %v491_v22 = vmul.f32 1.442695, %v487_v17  ;;  %v490_v23 = vsub.f32 %v472_v6, %v486_v18  ;;  %v2101_v6 = vld [vmem:[#allocation2 + $0x30] sm:$0xff]  }
 0x30a   :  { %v480_v24 = vpop.xlane.xlu0 %479 }
 0x30b   :  { %2114 = vpow2.f32 %v491_v22  ;;  %v488_v25 = vsub.f32 %v464_v9, %v480_v24  ;;  %v497_v26 = vmul.f32 1.442695, %v490_v23 }
 0x30c   :  { %2116 = vpow2.f32 %v495_v19 }
 0x30d   :  { %v493_v27 = vmul.f32 1.442695, %v488_v25 }
 0x30f   :  { %2118 = vpow2.f32 %v493_v27 }
 0x310   :  { %2120 = vpow2.f32 %v497_v26 }
 0x318   :  { %v2115_v28 = vpop.eup %2114 }
 0x319   :  { %v499_v29 = vsel %vm216_vm2, %v2115_v28, 0.0  ;;  %v2117_v30 = vpop.eup %2116 }
 0x31a   :  { %500 = vadd.xlane.f32.xlu0 %v499_v29  ;;  %v505_v32 = vsel %vm216_vm2, %v2117_v30, 0.0 }
 0x31c   :  { %v2119_v31 = vpop.eup %2118 }
 0x31d   :  { %v502_v33 = vsel %vm216_vm2, %v2119_v31, 0.0  ;;  %v2121_v34 = vpop.eup %2120 }
 0x31e   :  { %506 = vadd.xlane.f32.xlu0 %v505_v32  ;;  %503 = vadd.xlane.f32.xlu1 %v502_v33  ;;  %v508_v36 = vsel %vm216_vm2, %v2121_v34, 0.0 }
 0x322   :  { %509 = vadd.xlane.f32.xlu1 %v508_v36 }
 0x3a3   :  { %v501_v47 = vpop.xlane.xlu0 %500 }
 0x3a4   :  { %2122 = vrcp.f32 %v501_v47 }
 0x3a7   :  { %v504_v48 = vpop.xlane.xlu1 %503  ;;  %v507_v49 = vpop.xlane.xlu0 %506 }
 0x3a8   :  { %2124 = vrcp.f32 %v504_v48 }
 0x3a9   :  { %2126 = vrcp.f32 %v507_v49 }
 0x3ab   :  { %v510_v50 = vpop.xlane.xlu1 %509 }
 0x3ac   :  { %2128 = vrcp.f32 %v510_v50 }
 0x3b1   :  { %v2123_v51 = vpop.eup %2122 }
 0x3b2   :  { %v515_v53 = vmul.f32 %v2123_v51, %v2115_v28 }
 0x3b5   :  { %v2125_v52 = vpop.eup %2124 }
 0x3b6   :  { %v516_v54 = vmul.f32 %v2125_v52, %v2119_v31  ;;  %v2127_v55 = vpop.eup %2126 }
 0x3b7   :  { %v517_v60 = vmul.f32 %v2127_v55, %v2117_v30 }
 0x3b8   :  { %v519_v57 = vpack.c.bf16 %v516_v54, %v515_v53  ;;  %v1820_v53 = vld [vmem:[%s2592_s5 + $0x6] ss:$0 sm:$0xff] }
 0x3b9   :  { %v2129_v59 = vpop.eup %2128 }
 0x3ba   :  { %2000 = vmatprep.mubr.msk.bf16.mxu1 %vm216_vm2, %v519_v57  ;;  %v518_v62 = vmul.f32 %v2129_v59, %v2121_v34 }
 0x3bc   :  { %v520_v63 = vpack.c.bf16 %v518_v62, %v517_v60  ;;  %v1821_v60 = vld [vmem:[%s2592_s5 + $0x7] ss:$0 sm:$0xff] }
 0x3be   :  { %2001 = vmatmul.mubr.msk.bf16.vlgmr.msra.gmra.mxu1 %vm216_vm2, %v520_v63 }
 0x3bf   :  { %2005 = vmatpush3.bf16.msra.mxu1 %v2100_v0 }
 0x3c0   :  { %2006 = vmatprep.subr.bf16.mxu1 %v2101_v6 }
 0x3c3   :  { %2007 = vmatpush3.bf16.msra.mxu1 %v2101_v6 }
 0x47e   :  { %v2002_v7 = vpop.f32.mrf.mxu1 }
 0x47f   :  { %v580_v14 = vadd.f32 %v2002_v7, %v2302_v21 }
 0x480   :  { %v563_v8 = vpop.f32.mrf.mxu1 }
 0x481   :  { %v578_v10 = vadd.f32 %v563_v8, %v2290_v13  ;;  %v585_v22 = vsel %vm216_vm2, %v580_v14, 0.0 }
 0x482   :  { %v2003_v9 = vpop.f32.mrf.mxu1 }
 0x483   :  { %v582_v16 = vsel %vm216_vm2, %v578_v10, 0.0  ;;  %v581_v17 = vadd.f32 %v2003_v9, %v2297_v20 }
 0x484   :  { %v566_v11 = vpop.f32.mrf.mxu1 }
 0x485   :  { %v579_v15 = vadd.f32 %v566_v11, %v2285_v12  ;;  %v587_v24 = vsel %vm216_vm2, %v581_v17, 0.0 }
 0x487   :  { %v583_v18 = vsel %vm216_vm2, %v579_v15, 0.0 }
 0x488   :  { %v584_v19 = vadd.f32 %v583_v18, %v582_v16  ;;  %v2103_v16 = vld [vmem:[#allocation2 + $0x40] sm:$0xff]  }
 0x48a   :  { %v586_v23 = vadd.f32 %v585_v22, %v584_v19  ;;  %v1822_v19 = vld [vmem:[%s2592_s5 + $0x4] ss:$0 sm:$0xff] }
 0x48c   :  { %v588_v25 = vadd.f32 %v587_v24, %v586_v23 }
 0x48e   :  { %v589_v26 = vrot.slane %v588_v25, 4 }
 0x490   :  { %v590_v13 = vadd.f32 %v589_v26, %v588_v25 }
 0x492   :  { %v591_v27 = vrot.slane %v590_v13, 2 }
 0x494   :  { %v592_v28 = vadd.f32 %v591_v27, %v590_v13 }
 0x496   :  { %v593_v21 = vrot.slane %v592_v28, 1 }
 0x498   :  { %v594_v29 = vadd.f32 %v593_v21, %v592_v28 }
 0x49a   :  { %v596_v12 = vmul.f32 0.03125, %v594_v29 }
 0x49c   :  { %v597_v30 = vsub.f32 %v578_v10, %v596_v12  ;;  %v598_v31 = vsub.f32 %v579_v15, %v596_v12  ;;  %v599_v32 = vsub.f32 %v580_v14, %v596_v12  ;;  %v600_v20 = vsub.f32 %v581_v17, %v596_v12  ;;  %v2102_v15 = vld [vmem:[#allocation2 + $0x48] sm:$0xff]   ;;  %v1836_v17 = vld [vmem:[%s2591_s4 + $0x2] sm:$0x3] }
 0x49d   :  { %2012 = vmatprep.subr.bf16.mxu0 %v2102_v15  ;;  %2020 = vmatprep.subr.msk.mxu1 %vm105_vm0, %v1836_v17 }
 0x49e   :  { %v601_v33 = vmul.f32 %v597_v30, %v597_v30  ;;  %v602_v34 = vmul.f32 %v598_v31, %v598_v31  ;;  %v603_v35 = vmul.f32 %v599_v32, %v599_v32  ;;  %v604_v36 = vmul.f32 %v600_v20, %v600_v20  ;;  %2013 = vmatpush3.bf16.msra.mxu0 %v2102_v15 }
 0x49f   :  { %2014 = vmatprep.subr.bf16.mxu0 %v2103_v16 }
 0x4a0   :  { %v605_v37 = vsel %vm216_vm2, %v601_v33, 0.0  ;;  %v606_v38 = vsel %vm216_vm2, %v602_v34, 0.0  ;;  %v608_v40 = vsel %vm216_vm2, %v603_v35, 0.0  ;;  %v610_v42 = vsel %vm216_vm2, %v604_v36, 0.0 }
 0x4a1   :  { %v607_v39 = vadd.f32 %v606_v38, %v605_v37 }
 0x4a2   :  { %2015 = vmatpush3.bf16.msra.mxu0 %v2103_v16 }
 0x4a3   :  { %v609_v41 = vadd.f32 %v608_v40, %v607_v39 }
 0x4a5   :  { %v611_v43 = vadd.f32 %v610_v42, %v609_v41 }
 0x4a7   :  { %v612_v44 = vrot.slane %v611_v43, 4 }
 0x4a9   :  { %v613_v45 = vadd.f32 %v612_v44, %v611_v43 }
 0x4ab   :  { %v614_v46 = vrot.slane %v613_v45, 2 }
 0x4ad   :  { %v615_v47 = vadd.f32 %v614_v46, %v613_v45 }
 0x4af   :  { %v616_v48 = vrot.slane %v615_v47, 1 }
 0x4b1   :  { %v617_v49 = vadd.f32 %v616_v48, %v615_v47 }
 0x4b3   :  { %v618_v50 = vmul.f32 0.03125, %v617_v49 }
 0x4b5   :  { %v619_v51 = vadd.f32 1e-05, %v618_v50 }
 0x4b7   :  { %2130 = vrsqrt.f32 %v619_v51 }
 0x4c4   :  { %v2131_v52 = vpop.eup %2130 }
 0x4c5   :  { %v622_v54 = vmul.f32 %v2131_v52, %v598_v31  ;;  %v623_v55 = vmul.f32 %v2131_v52, %v599_v32  ;;  %v624_v57 = vmul.f32 %v2131_v52, %v600_v20  ;;  %v621_v59 = vmul.f32 %v2131_v52, %v597_v30 }
 0x4c7   :  { %v630_v62 = vmul.f32 %v1820_v53, %v622_v54  ;;  %v631_v63 = vmul.f32 %v1820_v53, %v623_v55  ;;  %v632_v0 = vmul.f32 %v1820_v53, %v624_v57  ;;  %v629_v6 = vmul.f32 %v1820_v53, %v621_v59 }
 0x4c9   :  { %v2383_v7 = vadd.f32 %v1821_v60, %v630_v62  ;;  %v2385_v8 = vadd.f32 %v1821_v60, %v629_v6  ;;  %v2387_v9 = vadd.f32 %v1821_v60, %v631_v63  ;;  %v2389_v10 = vadd.f32 %v1821_v60, %v632_v0  ;;  %v1827_v62 = vld [vmem:[%s2592_s5 + $0x8] ss:$0 sm:$0xff] }
 0x4cb   :  { %v641_v11 = vpack.c.bf16 %v2383_v7, %v2385_v8  ;;  %v642_v14 = vpack.c.bf16 %v2389_v10, %v2387_v9 }
 0x4cd   :  { %2008 = vmatprep.mubr.msk.bf16.mxu1 %vm216_vm2, %v641_v11 }
 0x4ce   :  { %2009 = vmatmul.mubr.msk.bf16.vlgmr.msra.gmra.mxu1 %vm216_vm2, %v642_v14  ;;  %v1828_v14 = vld [vmem:[%s2592_s5 + $0x9] ss:$0 sm:$0xff] }
 0x4cf   :  { %2022 = vmatprep.mubr.msk.f32.mxu1 %vm92_vm1, %v2252_v1  ;;  %2021 = vmatpush3.msk.msra.mxu1 %vm105_vm0, %v1836_v17 }
 0x4d6   :  { %2023 = vmatmul.mubr.msk.f32.vlgmr.msra.gmra.mxu1 %vm92_vm1, %v2257_v2 }
 0x4d7   :  { %2025 = vmatprep.mubr.msk.f32.mxu1 %vm92_vm1, %v2265_v3 }
 0x4da   :  { %2026 = vmatmul.mubr.msk.f32.gmra.mxu1 %vm92_vm1, %v2271_v4 }
 0x58e   :  { %v2010_v1 = vpop.f32.mrf.mxu1 }
 0x58f   :  { %v708_v25 = vadd.f32 %v2010_v1, %v1822_v19 }
 0x590   :  { %v699_v18 = vpop.f32.mrf.mxu1 }
 0x591   :  { %v700_v23 = vadd.f32 %v1822_v19, %v699_v18  ;;  %v717_v28 = vsel %vm216_vm2, %v708_v25, 0.0 }
 0x592   :  { %v2011_v22 = vpop.f32.mrf.mxu1 }
 0x593   :  { %v714_v13 = vsel %vm216_vm2, %v700_v23, 0.0  ;;  %v711_v2 = vadd.f32 %v2011_v22, %v1822_v19 }
 0x594   :  { %v702_v24 = vpop.f32.mrf.mxu1 }
 0x595   :  { %v703_v26 = vadd.f32 %v1822_v19, %v702_v24  ;;  %v719_v21 = vsel %vm216_vm2, %v711_v2, 0.0 }
 0x597   :  { %v715_v27 = vsel %vm216_vm2, %v703_v26, 0.0 }
 0x598   :  { %v716_v3 = vadd.f32 %v715_v27, %v714_v13 }
 0x59a   :  { %v718_v4 = vadd.f32 %v717_v28, %v716_v3 }
 0x59c   :  { %v720_v29 = vadd.f32 %v719_v21, %v718_v4 }
 0x59e   :  { %v721_v12 = vrot.slane %v720_v29, 4 }
 0x5a0   :  { %v722_v30 = vadd.f32 %v721_v12, %v720_v29  ;;  %v2104_v29 = vld [vmem:[#allocation2 + $0x68] sm:$0xff]   ;;  %v2105_v12 = vld [vmem:[#allocation2 + $0x58] sm:$0xff]  }
 0x5a1   :  { %2036 = vmatprep.subr.bf16.mxu1 %v2104_v29  ;;  %2028 = vmatprep.subr.bf16.mxu0 %v2105_v12 }
 0x5a2   :  { %v723_v31 = vrot.slane %v722_v30, 2  ;;  %2037 = vmatpush3.bf16.msra.mxu1 %v2104_v29  ;;  %v1834_v29 = vld [vmem:[%s2592_s5 + $0xa] ss:$0 sm:$0xff] }
 0x5a4   :  { %v724_v32 = vadd.f32 %v723_v31, %v722_v30  ;;  %v2106_v30 = vld [vmem:[#allocation2 + $0x60] sm:$0xff]   ;;  %v2107_v31 = vld [vmem:[#allocation2 + $0x50] sm:$0xff]  }
 0x5a5   :  { %2038 = vmatprep.subr.bf16.mxu1 %v2106_v30 }
 0x5a6   :  { %v725_v20 = vrot.slane %v724_v32, 1  ;;  %2039 = vmatpush3.bf16.msra.mxu1 %v2106_v30  ;;  %v1849_v30 = vld [vmem:[%s2592_s5 + $0x13] ss:$0 sm:$0xff] }
 0x5a8   :  { %v726_v33 = vadd.f32 %v725_v20, %v724_v32  ;;  %v2429_v32 = vld [vmem:[#allocation2 + $0x78] sm:$0xff]  }
 0x5aa   :  { %v727_v34 = vmul.f32 0.03125, %v726_v33  ;;  %v1829_v33 = vld [vmem:[%s2592_s5 + $0x5] ss:$0 sm:$0xff] }
 0x5ac   :  { %v728_v35 = vsub.f32 %v700_v23, %v727_v34  ;;  %v729_v36 = vsub.f32 %v703_v26, %v727_v34  ;;  %v730_v37 = vsub.f32 %v708_v25, %v727_v34  ;;  %v731_v38 = vsub.f32 %v711_v2, %v727_v34 }
 0x5ae   :  { %v732_v39 = vmul.f32 %v728_v35, %v728_v35  ;;  %v733_v40 = vmul.f32 %v729_v36, %v729_v36  ;;  %v734_v41 = vmul.f32 %v730_v37, %v730_v37  ;;  %v735_v42 = vmul.f32 %v731_v38, %v731_v38 }
 0x5b0   :  { %v736_v43 = vsel %vm216_vm2, %v732_v39, 0.0  ;;  %v737_v44 = vsel %vm216_vm2, %v733_v40, 0.0  ;;  %v739_v46 = vsel %vm216_vm2, %v734_v41, 0.0  ;;  %v741_v48 = vsel %vm216_vm2, %v735_v42, 0.0 }
 0x5b1   :  { %v738_v45 = vadd.f32 %v737_v44, %v736_v43 }
 0x5b3   :  { %v740_v47 = vadd.f32 %v739_v46, %v738_v45 }
 0x5b5   :  { %v742_v49 = vadd.f32 %v741_v48, %v740_v47 }
 0x5b7   :  { %v743_v50 = vrot.slane %v742_v49, 4 }
 0x5b9   :  { %v744_v51 = vadd.f32 %v743_v50, %v742_v49 }
 0x5bb   :  { %v745_v52 = vrot.slane %v744_v51, 2 }
 0x5bd   :  { %v746_v53 = vadd.f32 %v745_v52, %v744_v51 }
 0x5bf   :  { %v747_v54 = vrot.slane %v746_v53, 1 }
 0x5c1   :  { %v748_v55 = vadd.f32 %v747_v54, %v746_v53 }
 0x5c3   :  { %v749_v57 = vmul.f32 0.03125, %v748_v55 }
 0x5c5   :  { %v750_v59 = vadd.f32 1e-05, %v749_v57 }
 0x5c7   :  { %2132 = vrsqrt.f32 %v750_v59 }
 0x5d4   :  { %v2133_v60 = vpop.eup %2132 }
 0x5d5   :  { %v752_v63 = vmul.f32 %v2133_v60, %v728_v35  ;;  %v753_v0 = vmul.f32 %v2133_v60, %v729_v36  ;;  %v754_v6 = vmul.f32 %v2133_v60, %v730_v37  ;;  %v755_v11 = vmul.f32 %v2133_v60, %v731_v38 }
 0x5d7   :  { %v760_v15 = vmul.f32 %v1827_v62, %v752_v63  ;;  %v761_v16 = vmul.f32 %v1827_v62, %v753_v0  ;;  %v762_v17 = vmul.f32 %v1827_v62, %v754_v6  ;;  %v763_v1 = vmul.f32 %v1827_v62, %v755_v11 }
 0x5d9   :  { %v769_v18 = vadd.f32 %v1828_v14, %v761_v16  ;;  %v770_v19 = vadd.f32 %v1828_v14, %v762_v17  ;;  %v771_v22 = vadd.f32 %v1828_v14, %v763_v1  ;;  %v768_v23 = vadd.f32 %v1828_v14, %v760_v15 }
 0x5db   :  { %vm772_vm3 = vcmp.ge.f32.partialorder %v768_v23, 0.0  ;;  %vm773_vm4 = vcmp.ge.f32.partialorder %v769_v18, 0.0  ;;  %v776_v24 = vmul.f32 0.01, %v768_v23  ;;  %v777_v25 = vmul.f32 0.01, %v769_v18 }
 0x5dc   :  { %vm774_vm5 = vcmp.ge.f32.partialorder %v770_v19, 0.0  ;;  %vm775_vm6 = vcmp.ge.f32.partialorder %v771_v22, 0.0  ;;  %v778_v26 = vmul.f32 0.01, %v770_v19  ;;  %v779_v13 = vmul.f32 0.01, %v771_v22 }
 0x5dd   :  { %v780_v2 = vsel %vm772_vm3, %v768_v23, %v776_v24  ;;  %v781_v27 = vsel %vm773_vm4, %v769_v18, %v777_v25 }
 0x5de   :  { %v784_v3 = vpack.c.bf16 %v781_v27, %v780_v2  ;;  %v782_v28 = vsel %vm774_vm5, %v770_v19, %v778_v26  ;;  %v783_v4 = vsel %vm775_vm6, %v771_v22, %v779_v13  ;;  %v2024_v27 = vpop.f32.mrf.mxu1 }
 0x5df   :  { %v785_v21 = vpack.c.bf16 %v783_v4, %v782_v28 }
 0x5e0   :  { %2016 = vmatprep.mubr.msk.bf16.mxu0 %vm216_vm2, %v784_v3  ;;  %v1032_v3 = vpop.f32.mrf.mxu1 }
 0x5e1   :  { %2017 = vmatmul.mubr.msk.bf16.vlgmr.msra.gmra.mxu0 %vm216_vm2, %v785_v21 }
 0x5e2   :  { %2029 = vmatpush3.bf16.msra.mxu0 %v2105_v12  ;;  %v2027_v28 = vpop.f32.mrf.mxu1 }
 0x5e3   :  { %2030 = vmatprep.subr.bf16.mxu0 %v2107_v31 }
 0x5e4   :  { %v1042_v4 = vpop.f32.mrf.mxu1 }
 0x5e6   :  { %2031 = vmatpush3.bf16.msra.mxu0 %v2107_v31 }
 0x5e7   :  { %2044 = vmatprep.subr.bf16.mxu0 %v2429_v32 }
 0x6a1   :  { %v2018_v20 = vpop.f32.mrf.mxu0 }
 0x6a2   :  { %v851_v37 = vadd.f32 %v2018_v20, %v1829_v33 }
 0x6a3   :  { %v842_v34 = vpop.f32.mrf.mxu0 }
 0x6a4   :  { %v843_v35 = vadd.f32 %v1829_v33, %v842_v34  ;;  %v859_v42 = vadd.f32 %v851_v37, %v2387_v9  ;;  %v1835_v34 = vld [vmem:[%s2592_s5 + $0xb] ss:$0 sm:$0xff] }
 0x6a5   :  { %v2019_v36 = vpop.f32.mrf.mxu0 }
 0x6a6   :  { %v857_v39 = vadd.f32 %v843_v35, %v2385_v8  ;;  %v854_v40 = vadd.f32 %v2019_v36, %v1829_v33  ;;  %v864_v48 = vsel %vm216_vm2, %v859_v42, 0.0  ;;  %v1048_v35 = vadd.f32 %v2027_v28, %v1849_v30 }
 0x6a7   :  { %v845_v38 = vpop.f32.mrf.mxu0  ;;  %v1043_v36 = vadd.f32 %v1849_v30, %v1042_v4 }
 0x6a8   :  { %v846_v41 = vadd.f32 %v1829_v33, %v845_v38  ;;  %v861_v44 = vsel %vm216_vm2, %v857_v39, 0.0  ;;  %v860_v45 = vadd.f32 %v854_v40, %v2389_v10 }
 0x6aa   :  { %v858_v43 = vadd.f32 %v846_v41, %v2383_v7  ;;  %v866_v50 = vsel %vm216_vm2, %v860_v45, 0.0  ;;  %v1038_v41 = vadd.f32 %v2024_v27, %v1849_v30 }
 0x6ac   :  { %v862_v46 = vsel %vm216_vm2, %v858_v43, 0.0 }
 0x6ad   :  { %v863_v47 = vadd.f32 %v862_v46, %v861_v44 }
 0x6af   :  { %v865_v49 = vadd.f32 %v864_v48, %v863_v47 }
 0x6b1   :  { %v867_v51 = vadd.f32 %v866_v50, %v865_v49 }
 0x6b3   :  { %v868_v8 = vrot.slane %v867_v51, 4 }
 0x6b5   :  { %v869_v52 = vadd.f32 %v868_v8, %v867_v51 }
 0x6b7   :  { %v870_v53 = vrot.slane %v869_v52, 2 }
 0x6b9   :  { %v871_v54 = vadd.f32 %v870_v53, %v869_v52  ;;  %v2109_v52 = vld [vmem:[#allocation2 + $0x70] sm:$0xff]  }
 0x6bb   :  { %v872_v9 = vrot.slane %v871_v54, 1 }
 0x6bd   :  { %v873_v55 = vadd.f32 %v872_v9, %v871_v54 }
 0x6bf   :  { %v874_v7 = vmul.f32 0.03125, %v873_v55 }
 0x6c1   :  { %v875_v57 = vsub.f32 %v857_v39, %v874_v7  ;;  %v876_v59 = vsub.f32 %v858_v43, %v874_v7  ;;  %v877_v60 = vsub.f32 %v859_v42, %v874_v7  ;;  %v878_v10 = vsub.f32 %v860_v45, %v874_v7  ;;  %v1860_v7 = vld [vmem:[%s2592_s5 + $0x11] ss:$0 sm:$0xff] }
 0x6c2   :  { %v1033_v42 = vadd.f32 %v1849_v30, %v1032_v3 }
 0x6c3   :  { %v879_v62 = vmul.f32 %v875_v57, %v875_v57  ;;  %v880_v63 = vmul.f32 %v876_v59, %v876_v59  ;;  %v881_v0 = vmul.f32 %v877_v60, %v877_v60  ;;  %v882_v6 = vmul.f32 %v878_v10, %v878_v10 }
 0x6c5   :  { %v883_v11 = vsel %vm216_vm2, %v879_v62, 0.0  ;;  %v884_v14 = vsel %vm216_vm2, %v880_v63, 0.0  ;;  %v886_v16 = vsel %vm216_vm2, %v881_v0, 0.0  ;;  %v888_v1 = vsel %vm216_vm2, %v882_v6, 0.0 }
 0x6c6   :  { %v885_v15 = vadd.f32 %v884_v14, %v883_v11 }
 0x6c8   :  { %v887_v17 = vadd.f32 %v886_v16, %v885_v15 }
 0x6ca   :  { %v889_v18 = vadd.f32 %v888_v1, %v887_v17 }
 0x6cc   :  { %v890_v19 = vrot.slane %v889_v18, 4 }
 0x6ce   :  { %v891_v22 = vadd.f32 %v890_v19, %v889_v18 }
 0x6d0   :  { %v892_v23 = vrot.slane %v891_v22, 2 }
 0x6d2   :  { %v893_v24 = vadd.f32 %v892_v23, %v891_v22  ;;  %v1865_v23 = vld [vmem:[%s2592_s5 + $0x12] ss:$0 sm:$0xff] }
 0x6d4   :  { %v894_v25 = vrot.slane %v893_v24, 1 }
 0x6d6   :  { %v895_v26 = vadd.f32 %v894_v25, %v893_v24 }
 0x6d8   :  { %v896_v13 = vmul.f32 0.03125, %v895_v26 }
 0x6da   :  { %v897_v2 = vadd.f32 1e-05, %v896_v13 }
 0x6dc   :  { %2134 = vrsqrt.f32 %v897_v2 }
 0x6e9   :  { %v2135_v21 = vpop.eup %2134 }
 0x6ea   :  { %v900_v12 = vmul.f32 %v2135_v21, %v876_v59  ;;  %v899_v31 = vmul.f32 %v2135_v21, %v875_v57  ;;  %v902_v20 = vmul.f32 %v2135_v21, %v878_v10  ;;  %v901_v33 = vmul.f32 %v2135_v21, %v877_v60 }
 0x6ec   :  { %v908_v37 = vmul.f32 %v1834_v29, %v900_v12  ;;  %v907_v38 = vmul.f32 %v1834_v29, %v899_v31  ;;  %v910_v39 = vmul.f32 %v1834_v29, %v902_v20  ;;  %v909_v40 = vmul.f32 %v1834_v29, %v901_v33 }
 0x6ee   :  { %v2456_v43 = vadd.f32 %v1835_v34, %v908_v37  ;;  %v2458_v44 = vadd.f32 %v1835_v34, %v907_v38  ;;  %v2460_v45 = vadd.f32 %v1835_v34, %v910_v39  ;;  %v2462_v46 = vadd.f32 %v1835_v34, %v909_v40 }
 0x6f0   :  { %v1052_v47 = vadd.f32 %v1038_v41, %v2456_v43  ;;  %v1051_v48 = vadd.f32 %v1033_v42, %v2458_v44  ;;  %v1054_v49 = vadd.f32 %v1048_v35, %v2460_v45  ;;  %v1053_v50 = vadd.f32 %v1043_v36, %v2462_v46 }
 0x6f1   :  { %v1193_v53 = vpack.c.bf16 %v2456_v43, %v2458_v44  ;;  %v1194_v54 = vpack.c.bf16 %v2460_v45, %v2462_v46 }
 0x6f2   :  { %v1055_v51 = vpack.c.bf16 %v1052_v47, %v1051_v48  ;;  %v1056_v8 = vpack.c.bf16 %v1054_v49, %v1053_v50 }
 0x6f4   :  { %2032 = vmatprep.mubr.msk.bf16.mxu0 %vm216_vm2, %v1055_v51  ;;  %2040 = vmatprep.mubr.msk.bf16.mxu1 %vm216_vm2, %v1055_v51 }
 0x6f5   :  { %2033 = vmatmul.mubr.msk.bf16.vlgmr.msra.gmra.mxu0 %vm216_vm2, %v1056_v8  ;;  %2041 = vmatmul.mubr.msk.bf16.vlgmr.msra.gmra.mxu1 %vm216_vm2, %v1056_v8 }
 0x6f6   :  { %2045 = vmatpush3.bf16.msra.mxu0 %v2429_v32  ;;  %2048 = vmatprep.mubr.msk.bf16.mxu0 %vm216_vm2, %v1193_v53  ;;  %v1855_v32 = vld [vmem:[%s2592_s5 + $0x10] ss:$0 sm:$0xff] }
 0x6f7   :  { %2046 = vmatprep.subr.bf16.mxu0 %v2109_v52 }
 0x6fa   :  { %2047 = vmatpush3.bf16.msra.mxu0 %v2109_v52 }
 0x6fd   :  { %2049 = vmatmul.mubr.msk.bf16.vlgmr.msra.gmra.mxu0 %vm216_vm2, %v1194_v54 }
 0x7b5   :  { %v2034_v9 = vpop.f32.mrf.mxu0  ;;  %v2042_v55 = vpop.f32.mrf.mxu1 }
 0x7b6   :  { %v1187_v62 = vadd.f32 %v2042_v55, %v1860_v7  ;;  %v1122_v12 = vadd.f32 %v2034_v9, %v1855_v32 }
 0x7b7   :  { %v1113_v57 = vpop.f32.mrf.mxu0  ;;  %v1178_v59 = vpop.f32.mrf.mxu1 }
 0x7b8   :  { %v1114_v0 = vadd.f32 %v1855_v32, %v1113_v57  ;;  %v1179_v14 = vadd.f32 %v1860_v7, %v1178_v59 }
 0x7b9   :  { %v2035_v60 = vpop.f32.mrf.mxu0  ;;  %v2043_v10 = vpop.f32.mrf.mxu1 }
 0x7ba   :  { %v1190_v63 = vadd.f32 %v2043_v10, %v1860_v7  ;;  %v1125_v29 = vadd.f32 %v2035_v60, %v1855_v32 }
 0x7bb   :  { %v1116_v6 = vpop.f32.mrf.mxu0  ;;  %v1181_v11 = vpop.f32.mrf.mxu1 }
 0x7bc   :  { %v1269_v15 = vpack.c.bf16 %v1190_v63, %v1187_v62  ;;  %v1117_v16 = vadd.f32 %v1855_v32, %v1116_v6  ;;  %v1182_v17 = vadd.f32 %v1860_v7, %v1181_v11  ;;  %v1267_v30 = vpack.c.bf16 %v1125_v29, %v1122_v12 }
 0x7bd   :  { %v2050_v1 = vpop.f32.mrf.mxu0 }
 0x7be   :  { %v1266_v18 = vpack.c.bf16 %v1117_v16, %v1114_v0  ;;  %v1268_v19 = vpack.c.bf16 %v1182_v17, %v1179_v14  ;;  %2086 = vmatprep.subr.msk.bf16.mxu1 %vm216_vm2, %v1269_v15  ;;  %v1280_v22 = vsel %vm216_vm2, %v1269_v15, 0  ;;  %v1260_v26 = vadd.f32 %v2050_v1, %v1865_v23 }
 0x7bf   :  { %v1251_v24 = vpop.f32.mrf.mxu0  ;;  %2053 = vmatpush3.bf16.xpose.msra.mxu1 %v1280_v22 }
 0x7c0   :  { %2087 = vmatprep.subr.msk.bf16.mxu1 %vm216_vm2, %v1268_v19  ;;  %2056 = vmatprep.mubr.msk.bf16.mxu1 %vm216_vm2, %v1266_v18  ;;  %v1252_v27 = vadd.f32 %v1865_v23, %v1251_v24  ;;  %v1277_v21 = vsel %vm216_vm2, %v1268_v19, 0  ;;  %v2111_v24 = vld [vmem:[#allocation2 + $0x80] sm:$0xff]  }
 0x7c1   :  { %v2051_v25 = vpop.f32.mrf.mxu0 }
 0x7c2   :  { %v1263_v13 = vadd.f32 %v2051_v25, %v1865_v23 }
 0x7c3   :  { %v1254_v2 = vpop.f32.mrf.mxu0 }
 0x7c4   :  { %v1378_v3 = vpack.c.bf16 %v1263_v13, %v1260_v26  ;;  %v1255_v28 = vadd.f32 %v1865_v23, %v1254_v2  ;;  %v2110_v23 = vld [vmem:[#allocation2 + $0x88] sm:$0xff]  }
 0x7c6   :  { %v1377_v4 = vpack.c.bf16 %v1255_v28, %v1252_v27  ;;  %2060 = vmatprep.subr.bf16.mxu0 %v1378_v3 }
 0x7c7   :  { %2055 = vmatpush3.bf16.xpose.msra.mxu1 %v1277_v21  ;;  %2061 = vmatpush3.bf16.msra.mxu0 %v1378_v3 }
 0x7c8   :  { %2062 = vmatprep.subr.bf16.mxu0 %v1377_v4 }
 0x7cb   :  { %2063 = vmatpush3.bf16.msra.mxu0 %v1377_v4 }
 0x7cc   :  { %2068 = vmatprep.subr.bf16.mxu0 %v2110_v23 }
 0x7ce   :  { %2057 = vmatmul.mubr.msk.bf16.vlgmr.msra.gmra.mxu1 %vm216_vm2, %v1267_v30 }
 0x88e   :  { %v2058_v31 = vpop.f32.mrf.mxu1 }
 0x88f   :  { %v1325_v35 = vadd.f32 %v2058_v31, %v2331_v56 }
 0x890   :  { %v1316_v20 = vpop.f32.mrf.mxu1 }
 0x891   :  { %v1317_v33 = vadd.f32 %v1316_v20, %v2336_v58  ;;  %v1337_v41 = vsel %vm216_vm2, %v1325_v35, -inf }
 0x892   :  { %v2059_v34 = vpop.f32.mrf.mxu1 }
 0x893   :  { %v1331_v36 = vsel %vm216_vm2, %v1317_v33, -inf  ;;  %v1328_v39 = vadd.f32 %v2059_v34, %v2342_v61 }
 0x894   :  { %v1319_v37 = vpop.f32.mrf.mxu1  ;;  %1332 = vmax.xlane.f32.xlu0 %v1331_v36 }
 0x895   :  { %v1320_v38 = vadd.f32 %v1319_v37, %v2349_v5  ;;  %v1340_v42 = vsel %vm216_vm2, %v1328_v39, -inf }
 0x897   :  { %v1334_v40 = vsel %vm216_vm2, %v1320_v38, -inf }
 0x898   :  { %1335 = vmax.xlane.f32.xlu1 %v1334_v40  ;;  %1338 = vmax.xlane.f32.xlu0 %v1337_v41 }
 0x89c   :  { %1341 = vmax.xlane.f32.xlu1 %v1340_v42 }
 0x91d   :  { %v1333_v58 = vpop.xlane.xlu0 %1332 }
 0x91e   :  { %v1343_v47 = vsub.f32 %v1317_v33, %v1333_v58 }
 0x920   :  { %v1347_v56 = vmul.f32 1.442695, %v1343_v47 }
 0x921   :  { %v1336_v48 = vpop.xlane.xlu1 %1335  ;;  %v1339_v49 = vpop.xlane.xlu0 %1338 }
 0x922   :  { %2136 = vpow2.f32 %v1347_v56  ;;  %v1344_v50 = vsub.f32 %v1320_v38, %v1336_v48  ;;  %v1345_v51 = vsub.f32 %v1325_v35, %v1339_v49 }
 0x924   :  { %v1349_v5 = vmul.f32 1.442695, %v1344_v50  ;;  %v1351_v8 = vmul.f32 1.442695, %v1345_v51 }
 0x925   :  { %v1342_v61 = vpop.xlane.xlu1 %1341 }
 0x926   :  { %2138 = vpow2.f32 %v1349_v5  ;;  %v1346_v52 = vsub.f32 %v1328_v39, %v1342_v61 }
 0x927   :  { %2140 = vpow2.f32 %v1351_v8 }
 0x928   :  { %v1353_v53 = vmul.f32 1.442695, %v1346_v52 }
 0x92a   :  { %2142 = vpow2.f32 %v1353_v53 }
 0x92f   :  { %v2137_v54 = vpop.eup %2136 }
 0x930   :  { %v1355_v9 = vsel %vm216_vm2, %v2137_v54, 0.0 }
 0x931   :  { %1356 = vadd.xlane.f32.xlu0 %v1355_v9 }
 0x933   :  { %v2139_v55 = vpop.eup %2138 }
 0x934   :  { %v2141_v7 = vpop.eup %2140  ;;  %v1358_v57 = vsel %vm216_vm2, %v2139_v55, 0.0 }
 0x935   :  { %1359 = vadd.xlane.f32.xlu1 %v1358_v57  ;;  %v1361_v59 = vsel %vm216_vm2, %v2141_v7, 0.0 }
 0x936   :  { %1362 = vadd.xlane.f32.xlu0 %v1361_v59 }
 0x937   :  { %v2143_v60 = vpop.eup %2142 }
 0x938   :  { %v1364_v10 = vsel %vm216_vm2, %v2143_v60, 0.0 }
 0x939   :  { %1365 = vadd.xlane.f32.xlu1 %v1364_v10 }
 0x9ba   :  { %v1357_v32 = vpop.xlane.xlu0 %1356 }
 0x9bb   :  { %2144 = vrcp.f32 %v1357_v32 }
 0x9be   :  { %v1360_v62 = vpop.xlane.xlu1 %1359 }
 0x9bf   :  { %2146 = vrcp.f32 %v1360_v62  ;;  %v1363_v63 = vpop.xlane.xlu0 %1362 }
 0x9c0   :  { %2148 = vrcp.f32 %v1363_v63 }
 0x9c2   :  { %v1366_v0 = vpop.xlane.xlu1 %1365 }
 0x9c3   :  { %2150 = vrcp.f32 %v1366_v0  ;;  %v1875_v0 = vld [vmem:[%s2592_s5 + $0x17] ss:$0 sm:$0xff] }
 0x9c8   :  { %v2145_v6 = vpop.eup %2144 }
 0x9c9   :  { %v1371_v14 = vmul.f32 %v2145_v6, %v2137_v54 }
 0x9cc   :  { %v2147_v11 = vpop.eup %2146 }
 0x9cd   :  { %v1372_v15 = vmul.f32 %v2147_v11, %v2139_v55  ;;  %v2149_v16 = vpop.eup %2148 }
 0x9ce   :  { %v1373_v18 = vmul.f32 %v2149_v16, %v2141_v7 }
 0x9cf   :  { %v1375_v17 = vpack.c.bf16 %v1372_v15, %v1371_v14 }
 0x9d0   :  { %v2151_v1 = vpop.eup %2150 }
 0x9d1   :  { %v1374_v19 = vmul.f32 %v2151_v1, %v2143_v60  ;;  %2064 = vmatprep.mubr.msk.bf16.mxu0 %vm216_vm2, %v1375_v17  ;;  %v1874_v60 = vld [vmem:[%s2592_s5 + $0x16] ss:$0 sm:$0xff] }
 0x9d3   :  { %v1376_v22 = vpack.c.bf16 %v1374_v19, %v1373_v18 }
 0x9d5   :  { %2065 = vmatmul.mubr.msk.bf16.vlgmr.msra.gmra.mxu0 %vm216_vm2, %v1376_v22 }
 0x9d6   :  { %2069 = vmatpush3.bf16.msra.mxu0 %v2110_v23  ;;  %v2112_v23 = vld [vmem:[#allocation2 + $0x98] sm:$0xff]  }
 0x9d7   :  { %2070 = vmatprep.subr.bf16.mxu0 %v2111_v24  ;;  %2076 = vmatprep.subr.bf16.mxu1 %v2112_v23 }
 0x9d8   :  { %2077 = vmatpush3.bf16.msra.mxu1 %v2112_v23 }
 0x9da   :  { %2071 = vmatpush3.bf16.msra.mxu0 %v2111_v24  ;;  %v2113_v24 = vld [vmem:[#allocation2 + $0x90] sm:$0xff]  }
 0x9db   :  { %2078 = vmatprep.subr.bf16.mxu1 %v2113_v24 }
 0x9dc   :  { %2079 = vmatpush3.bf16.msra.mxu1 %v2113_v24 }
 0xa95   :  { %v2066_v25 = vpop.f32.mrf.mxu0 }
 0xa96   :  { %v1436_v3 = vadd.f32 %v2066_v25, %v2462_v46 }
 0xa97   :  { %v1419_v26 = vpop.f32.mrf.mxu0 }
 0xa98   :  { %v1434_v2 = vadd.f32 %v1419_v26, %v2458_v44  ;;  %v1441_v30 = vsel %vm216_vm2, %v1436_v3, 0.0 }
 0xa99   :  { %v2067_v13 = vpop.f32.mrf.mxu0 }
 0xa9a   :  { %v1438_v4 = vsel %vm216_vm2, %v1434_v2, 0.0  ;;  %v1437_v21 = vadd.f32 %v2067_v13, %v2460_v45  ;;  %v1876_v13 = vld [vmem:[%s2592_s5 + $0x14] ss:$0 sm:$0xff] }
 0xa9b   :  { %v1422_v27 = vpop.f32.mrf.mxu0 }
 0xa9c   :  { %v1435_v28 = vadd.f32 %v1422_v27, %v2456_v43  ;;  %v1443_v20 = vsel %vm216_vm2, %v1437_v21, 0.0 }
 0xa9e   :  { %v1439_v29 = vsel %vm216_vm2, %v1435_v28, 0.0 }
 0xa9f   :  { %v1440_v12 = vadd.f32 %v1439_v29, %v1438_v4 }
 0xaa1   :  { %v1442_v31 = vadd.f32 %v1441_v30, %v1440_v12 }
 0xaa3   :  { %v1444_v33 = vadd.f32 %v1443_v20, %v1442_v31 }
 0xaa5   :  { %v1445_v34 = vrot.slane %v1444_v33, 4 }
 0xaa7   :  { %v1446_v44 = vadd.f32 %v1445_v34, %v1444_v33 }
 0xaa9   :  { %v1447_v35 = vrot.slane %v1446_v44, 2 }
 0xaab   :  { %v1448_v36 = vadd.f32 %v1447_v35, %v1446_v44 }
 0xaad   :  { %v1449_v46 = vrot.slane %v1448_v36, 1 }
 0xaaf   :  { %v1450_v37 = vadd.f32 %v1449_v46, %v1448_v36 }
 0xab1   :  { %v1451_v43 = vmul.f32 0.03125, %v1450_v37 }
 0xab3   :  { %v1452_v38 = vsub.f32 %v1434_v2, %v1451_v43  ;;  %v1453_v39 = vsub.f32 %v1435_v28, %v1451_v43  ;;  %v1454_v40 = vsub.f32 %v1436_v3, %v1451_v43  ;;  %v1455_v45 = vsub.f32 %v1437_v21, %v1451_v43 }
 0xab5   :  { %v1456_v41 = vmul.f32 %v1452_v38, %v1452_v38  ;;  %v1457_v42 = vmul.f32 %v1453_v39, %v1453_v39  ;;  %v1458_v58 = vmul.f32 %v1454_v40, %v1454_v40  ;;  %v1459_v47 = vmul.f32 %v1455_v45, %v1455_v45 }
 0xab7   :  { %v1460_v56 = vsel %vm216_vm2, %v1456_v41, 0.0  ;;  %v1461_v48 = vsel %vm216_vm2, %v1457_v42, 0.0  ;;  %v1463_v50 = vsel %vm216_vm2, %v1458_v58, 0.0  ;;  %v1465_v5 = vsel %vm216_vm2, %v1459_v47, 0.0 }
 0xab8   :  { %v1462_v49 = vadd.f32 %v1461_v48, %v1460_v56 }
 0xaba   :  { %v1464_v51 = vadd.f32 %v1463_v50, %v1462_v49 }
 0xabc   :  { %v1466_v8 = vadd.f32 %v1465_v5, %v1464_v51 }
 0xabe   :  { %v1467_v61 = vrot.slane %v1466_v8, 4 }
 0xac0   :  { %v1468_v52 = vadd.f32 %v1467_v61, %v1466_v8 }
 0xac2   :  { %v1469_v53 = vrot.slane %v1468_v52, 2 }
 0xac4   :  { %v1470_v54 = vadd.f32 %v1469_v53, %v1468_v52 }
 0xac6   :  { %v1471_v9 = vrot.slane %v1470_v54, 1 }
 0xac8   :  { %v1472_v55 = vadd.f32 %v1471_v9, %v1470_v54 }
 0xaca   :  { %v1473_v7 = vmul.f32 0.03125, %v1472_v55 }
 0xacc   :  { %v1474_v57 = vadd.f32 1e-05, %v1473_v7 }
 0xace   :  { %2152 = vrsqrt.f32 %v1474_v57 }
 0xadb   :  { %v2153_v59 = vpop.eup %2152 }
 0xadc   :  { %v1477_v10 = vmul.f32 %v2153_v59, %v1453_v39  ;;  %v1478_v32 = vmul.f32 %v2153_v59, %v1454_v40  ;;  %v1479_v62 = vmul.f32 %v2153_v59, %v1455_v45  ;;  %v1476_v63 = vmul.f32 %v2153_v59, %v1452_v38 }
 0xade   :  { %v1485_v6 = vmul.f32 %v1874_v60, %v1477_v10  ;;  %v1486_v11 = vmul.f32 %v1874_v60, %v1478_v32  ;;  %v1487_v14 = vmul.f32 %v1874_v60, %v1479_v62  ;;  %v1484_v15 = vmul.f32 %v1874_v60, %v1476_v63  ;;  %v1881_v10 = vld [vmem:[%s2592_s5 + $0x18] ss:$0 sm:$0xff] }
 0xae0   :  { %v2526_v16 = vadd.f32 %v1875_v0, %v1485_v6  ;;  %v2528_v17 = vadd.f32 %v1875_v0, %v1484_v15  ;;  %v2530_v1 = vadd.f32 %v1875_v0, %v1486_v11  ;;  %v2532_v18 = vadd.f32 %v1875_v0, %v1487_v14  ;;  %v1882_v6 = vld [vmem:[%s2592_s5 + $0x19] ss:$0 sm:$0xff] }
 0xae2   :  { %v1496_v19 = vpack.c.bf16 %v2526_v16, %v2528_v17  ;;  %v1497_v22 = vpack.c.bf16 %v2532_v18, %v2530_v1 }
 0xae4   :  { %2072 = vmatprep.mubr.msk.bf16.mxu0 %vm216_vm2, %v1496_v19 }
 0xae5   :  { %2073 = vmatmul.mubr.msk.bf16.vlgmr.msra.gmra.mxu0 %vm216_vm2, %v1497_v22 }
 0xba5   :  { %v2074_v25 = vpop.f32.mrf.mxu0 }
 0xba6   :  { %v1563_v28 = vadd.f32 %v2074_v25, %v1876_v13 }
 0xba7   :  { %v1554_v26 = vpop.f32.mrf.mxu0 }
 0xba8   :  { %v1555_v27 = vadd.f32 %v1876_v13, %v1554_v26  ;;  %v1572_v31 = vsel %vm216_vm2, %v1563_v28, 0.0 }
 0xba9   :  { %v2075_v2 = vpop.f32.mrf.mxu0 }
 0xbaa   :  { %v1569_v21 = vsel %vm216_vm2, %v1555_v27, 0.0  ;;  %v1566_v29 = vadd.f32 %v2075_v2, %v1876_v13 }
 0xbab   :  { %v1557_v3 = vpop.f32.mrf.mxu0 }
 0xbac   :  { %v1558_v4 = vadd.f32 %v1876_v13, %v1557_v3  ;;  %v1574_v33 = vsel %vm216_vm2, %v1566_v29, 0.0 }
 0xbae   :  { %v1570_v12 = vsel %vm216_vm2, %v1558_v4, 0.0 }
 0xbaf   :  { %v1571_v30 = vadd.f32 %v1570_v12, %v1569_v21 }
 0xbb1   :  { %v1573_v20 = vadd.f32 %v1572_v31, %v1571_v30  ;;  %v1883_v31 = vld [vmem:[%s2592_s5 + $0x15] ss:$0 sm:$0xff] }
 0xbb3   :  { %v1575_v34 = vadd.f32 %v1574_v33, %v1573_v20 }
 0xbb5   :  { %v1576_v44 = vrot.slane %v1575_v34, 4 }
 0xbb7   :  { %v1577_v35 = vadd.f32 %v1576_v44, %v1575_v34 }
 0xbb9   :  { %v1578_v36 = vrot.slane %v1577_v35, 2 }
 0xbbb   :  { %v1579_v46 = vadd.f32 %v1578_v36, %v1577_v35 }
 0xbbd   :  { %v1580_v37 = vrot.slane %v1579_v46, 1 }
 0xbbf   :  { %v1581_v43 = vadd.f32 %v1580_v37, %v1579_v46 }
 0xbc1   :  { %v1582_v38 = vmul.f32 0.03125, %v1581_v43 }
 0xbc3   :  { %v1583_v39 = vsub.f32 %v1555_v27, %v1582_v38  ;;  %v1584_v40 = vsub.f32 %v1558_v4, %v1582_v38  ;;  %v1585_v45 = vsub.f32 %v1563_v28, %v1582_v38  ;;  %v1586_v41 = vsub.f32 %v1566_v29, %v1582_v38 }
 0xbc5   :  { %v1587_v42 = vmul.f32 %v1583_v39, %v1583_v39  ;;  %v1588_v58 = vmul.f32 %v1584_v40, %v1584_v40  ;;  %v1589_v47 = vmul.f32 %v1585_v45, %v1585_v45  ;;  %v1590_v56 = vmul.f32 %v1586_v41, %v1586_v41 }
 0xbc7   :  { %v1591_v48 = vsel %vm216_vm2, %v1587_v42, 0.0  ;;  %v1592_v49 = vsel %vm216_vm2, %v1588_v58, 0.0  ;;  %v1594_v51 = vsel %vm216_vm2, %v1589_v47, 0.0  ;;  %v1596_v8 = vsel %vm216_vm2, %v1590_v56, 0.0 }
 0xbc8   :  { %v1593_v50 = vadd.f32 %v1592_v49, %v1591_v48 }
 0xbca   :  { %v1595_v5 = vadd.f32 %v1594_v51, %v1593_v50 }
 0xbcc   :  { %v1597_v61 = vadd.f32 %v1596_v8, %v1595_v5 }
 0xbce   :  { %v1598_v52 = vrot.slane %v1597_v61, 4 }
 0xbd0   :  { %v1599_v53 = vadd.f32 %v1598_v52, %v1597_v61 }
 0xbd2   :  { %v1600_v54 = vrot.slane %v1599_v53, 2 }
 0xbd4   :  { %v1601_v9 = vadd.f32 %v1600_v54, %v1599_v53 }
 0xbd6   :  { %v1602_v55 = vrot.slane %v1601_v9, 1 }
 0xbd8   :  { %v1603_v7 = vadd.f32 %v1602_v55, %v1601_v9 }
 0xbda   :  { %v1604_v57 = vmul.f32 0.03125, %v1603_v7 }
 0xbdc   :  { %v1605_v59 = vadd.f32 1e-05, %v1604_v57 }
 0xbde   :  { %2154 = vrsqrt.f32 %v1605_v59 }
 0xbeb   :  { %v2155_v60 = vpop.eup %2154 }
 0xbec   :  { %v1607_v32 = vmul.f32 %v2155_v60, %v1583_v39  ;;  %v1608_v62 = vmul.f32 %v2155_v60, %v1584_v40  ;;  %v1609_v63 = vmul.f32 %v2155_v60, %v1585_v45  ;;  %v1610_v0 = vmul.f32 %v2155_v60, %v1586_v41 }
 0xbee   :  { %v1615_v11 = vmul.f32 %v1881_v10, %v1607_v32  ;;  %v1616_v14 = vmul.f32 %v1881_v10, %v1608_v62  ;;  %v1617_v15 = vmul.f32 %v1881_v10, %v1609_v63  ;;  %v1618_v19 = vmul.f32 %v1881_v10, %v1610_v0 }
 0xbf0   :  { %v1624_v22 = vadd.f32 %v1882_v6, %v1616_v14  ;;  %v1625_v23 = vadd.f32 %v1882_v6, %v1617_v15  ;;  %v1626_v24 = vadd.f32 %v1882_v6, %v1618_v19  ;;  %v1623_v25 = vadd.f32 %v1882_v6, %v1615_v11 }
 0xbf2   :  { %vm1627_vm7 = vcmp.ge.f32.partialorder %v1623_v25, 0.0  ;;  %vm1628_vm8 = vcmp.ge.f32.partialorder %v1624_v22, 0.0  ;;  %v1631_v26 = vmul.f32 0.01, %v1623_v25  ;;  %v1632_v13 = vmul.f32 0.01, %v1624_v22 }
 0xbf3   :  { %vm1629_vm9 = vcmp.ge.f32.partialorder %v1625_v23, 0.0  ;;  %vm1630_vm10 = vcmp.ge.f32.partialorder %v1626_v24, 0.0  ;;  %v1633_v2 = vmul.f32 0.01, %v1625_v23  ;;  %v1634_v27 = vmul.f32 0.01, %v1626_v24 }
 0xbf4   :  { %v1635_v3 = vsel %vm1627_vm7, %v1623_v25, %v1631_v26  ;;  %v1636_v28 = vsel %vm1628_vm8, %v1624_v22, %v1632_v13 }
 0xbf5   :  { %v1639_v4 = vpack.c.bf16 %v1636_v28, %v1635_v3  ;;  %v1637_v21 = vsel %vm1629_vm9, %v1625_v23, %v1633_v2  ;;  %v1638_v29 = vsel %vm1630_vm10, %v1626_v24, %v1634_v27  ;;  %v1888_v23 = vld [vmem:[%s2592_s5 + $0x1a] ss:$0 sm:$0xff]  ;;  %v1889_v2 = vld [vmem:[%s2592_s5 + $0x1b] ss:$0 sm:$0xff]  ;;  %s2178_s5 = scalar_lea.vmem %s1784_s21, 512 }
 0xbf6   :  { %v1640_v12 = vpack.c.bf16 %v1638_v29, %v1637_v21  ;;  %p2179_p5 = scmp.ne.s32.totalorder %s1784_s21, %s2178_s5  ;;  %p2184_p7 = scmp.lt.s32.totalorder %s2178_s5, %s2178_s5 }
 0xbf7   :  { %2080 = vmatprep.mubr.msk.bf16.mxu1 %vm216_vm2, %v1639_v4 }
 0xbf8   :  { %2081 = vmatmul.mubr.msk.bf16.vlgmr.msra.gmra.mxu1 %vm216_vm2, %v1640_v12  ;;  %p2185_p8 = por %p2184_p7, %p2183_p6 }
 0xbfa   :  { %p2186_p9 = pnand %p2185_p8, %p2179_p5 }
 0xcb8   :  { %v2082_v30 = vpop.f32.mrf.mxu1 }
 0xcb9   :  { %v1706_v44 = vadd.f32 %v2082_v30, %v1883_v31 }
 0xcba   :  { %v1697_v20 = vpop.f32.mrf.mxu1 }
 0xcbb   :  { %v1698_v33 = vadd.f32 %v1883_v31, %v1697_v20  ;;  %v1714_v43 = vadd.f32 %v1706_v44, %v2530_v1 }
 0xcbc   :  { %v2083_v34 = vpop.f32.mrf.mxu1 }
 0xcbd   :  { %v1712_v36 = vadd.f32 %v1698_v33, %v2528_v17  ;;  %v1709_v46 = vadd.f32 %v2083_v34, %v1883_v31  ;;  %v1719_v42 = vsel %vm216_vm2, %v1714_v43, 0.0 }
 0xcbe   :  { %v1700_v35 = vpop.f32.mrf.mxu1 }
 0xcbf   :  { %v1701_v37 = vadd.f32 %v1883_v31, %v1700_v35  ;;  %v1716_v39 = vsel %vm216_vm2, %v1712_v36, 0.0  ;;  %v1715_v40 = vadd.f32 %v1709_v46, %v2532_v18 }
 0xcc1   :  { %v1713_v38 = vadd.f32 %v1701_v37, %v2526_v16  ;;  %v1721_v47 = vsel %vm216_vm2, %v1715_v40, 0.0 }
 0xcc3   :  { %v1717_v45 = vsel %vm216_vm2, %v1713_v38, 0.0 }
 0xcc4   :  { %v1718_v41 = vadd.f32 %v1717_v45, %v1716_v39 }
 0xcc6   :  { %v1720_v58 = vadd.f32 %v1719_v42, %v1718_v41 }
 0xcc8   :  { %v1722_v56 = vadd.f32 %v1721_v47, %v1720_v58 }
 0xcca   :  { %v1723_v17 = vrot.slane %v1722_v56, 4 }
 0xccc   :  { %v1724_v48 = vadd.f32 %v1723_v17, %v1722_v56 }
 0xcce   :  { %v1725_v49 = vrot.slane %v1724_v48, 2 }
 0xcd0   :  { %v1726_v50 = vadd.f32 %v1725_v49, %v1724_v48 }
 0xcd2   :  { %v1727_v1 = vrot.slane %v1726_v50, 1 }
 0xcd4   :  { %v1728_v51 = vadd.f32 %v1727_v1, %v1726_v50 }
 0xcd6   :  { %v1729_v16 = vmul.f32 0.03125, %v1728_v51 }
 0xcd8   :  { %v1730_v5 = vsub.f32 %v1712_v36, %v1729_v16  ;;  %v1731_v8 = vsub.f32 %v1713_v38, %v1729_v16  ;;  %v1732_v61 = vsub.f32 %v1714_v43, %v1729_v16  ;;  %v1733_v18 = vsub.f32 %v1715_v40, %v1729_v16 }
 0xcda   :  { %v1734_v52 = vmul.f32 %v1730_v5, %v1730_v5  ;;  %v1735_v53 = vmul.f32 %v1731_v8, %v1731_v8  ;;  %v1736_v54 = vmul.f32 %v1732_v61, %v1732_v61  ;;  %v1737_v9 = vmul.f32 %v1733_v18, %v1733_v18 }
 0xcdc   :  { %v1738_v55 = vsel %vm216_vm2, %v1734_v52, 0.0  ;;  %v1739_v7 = vsel %vm216_vm2, %v1735_v53, 0.0  ;;  %v1741_v59 = vsel %vm216_vm2, %v1736_v54, 0.0  ;;  %v1743_v10 = vsel %vm216_vm2, %v1737_v9, 0.0 }
 0xcdd   :  { %v1740_v57 = vadd.f32 %v1739_v7, %v1738_v55 }
 0xcdf   :  { %v1742_v60 = vadd.f32 %v1741_v59, %v1740_v57 }
 0xce1   :  { %v1744_v32 = vadd.f32 %v1743_v10, %v1742_v60 }
 0xce3   :  { %v1745_v62 = vrot.slane %v1744_v32, 4 }
 0xce5   :  { %v1746_v63 = vadd.f32 %v1745_v62, %v1744_v32 }
 0xce7   :  { %v1747_v0 = vrot.slane %v1746_v63, 2 }
 0xce9   :  { %v1748_v6 = vadd.f32 %v1747_v0, %v1746_v63 }
 0xceb   :  { %v1749_v11 = vrot.slane %v1748_v6, 1 }
 0xced   :  { %v1750_v14 = vadd.f32 %v1749_v11, %v1748_v6 }
 0xcef   :  { %v1751_v15 = vmul.f32 0.03125, %v1750_v14 }
 0xcf1   :  { %v1752_v19 = vadd.f32 1e-05, %v1751_v15 }
 0xcf3   :  { %2156 = vrsqrt.f32 %v1752_v19 }
 0xd00   :  { %v2157_v22 = vpop.eup %2156 }
 0xd01   :  { %v1754_v24 = vmul.f32 %v2157_v22, %v1730_v5  ;;  %v1755_v25 = vmul.f32 %v2157_v22, %v1731_v8  ;;  %v1756_v26 = vmul.f32 %v2157_v22, %v1732_v61  ;;  %v1757_v13 = vmul.f32 %v2157_v22, %v1733_v18 }
 0xd03   :  { %v1762_v27 = vmul.f32 %v1888_v23, %v1754_v24  ;;  %v1763_v3 = vmul.f32 %v1888_v23, %v1755_v25  ;;  %v1764_v28 = vmul.f32 %v1888_v23, %v1756_v26  ;;  %v1765_v4 = vmul.f32 %v1888_v23, %v1757_v13 }
 0xd05   :  { %v1770_v21 = vadd.f32 %v1889_v2, %v1762_v27  ;;  %v1771_v29 = vadd.f32 %v1889_v2, %v1763_v3  ;;  %v1772_v12 = vadd.f32 %v1889_v2, %v1764_v28  ;;  %v1773_v30 = vadd.f32 %v1889_v2, %v1765_v4 }
 0xd07   :  { %1775 = vst.msk [vmem:[#allocation5 + $0x8] sm:$0xff] %vm216_vm2, %v1771_v29  ;;  %1774 = vst.msk [vmem:[#allocation5] sm:$0xff] %vm216_vm2, %v1770_v21 }
 0xd08   :  { %1776 = vst.msk [vmem:[#allocation5 + $0x10] sm:$0xff] %vm216_vm2, %v1772_v12  ;;  %1777 = vst.msk [vmem:[#allocation5 + $0x18] sm:$0xff] %vm216_vm2, %v1773_v30 }
 0xd09   :  { %2189 = shalt.err (!%p2186_p9)
}
 0xd0a   :  { %s2206_s0 = smov 128   ;;  %s2207_s22 = smov 8  }
 0xd0b   :  { %1789 = dma.vmem_to_hbm [thread:$0]  %s1784_s21, 512, %s2593_s6, [#allocation4], %s2206_s0, %s2206_s0, %s2207_s22  }
 0xd0c   :  { %2200 = dma.done.wait [#allocation4], 512  }
 0xd0d   :  { %2201 = vsyncadd [#allocation4], 4294966784 }
 0xd0e   :  { %1793 = vsyncpa [#allocation3], 1 }
 0xd0f   :  { %1794 = vsyncpa [#allocation4], 1 }

</bundles_post_ra>
